<compile_context>
chip_gen: v7x
topology: tpu7x:2x2x1
jax: 0.10.0
libtpu: 0.0.40
codegen_flags: <defaults>
</compile_context>

<pallas_src>
import functools
import math

import jax
import jax.numpy as jnp
from jax.experimental import pallas as pl
from jax.experimental.pallas import tpu as pltpu

# ---------------- small synthetic BERT config ----------------
VOCAB = 100
HIDDEN = 128
N_LAYERS = 2
N_HEADS = 4
HEAD_DIM = HIDDEN // N_HEADS
INTERMEDIATE = 256
MAX_POS = 32
TYPE_VOCAB = 2
LN_EPS = 1e-12
DROPOUT_P = 0.1


# ---------------- LayerNorm helper (pure jnp: usable in-kernel and as glue) ----------------
def _layernorm(x, g, b, eps=LN_EPS):
    mu = jnp.mean(x, axis=-1, keepdims=True)
    xc = x - mu
    var = jnp.mean(xc * xc, axis=-1, keepdims=True)
    return xc * jax.lax.rsqrt(var + eps) * g + b


# ---------------- fused encoder + pooler kernel, grid = (B, N_LAYERS) ----------------
def _bert_kernel(h0_ref, mask_ref, u_ref,
                 wqkv_ref, bqkv_ref, wo_ref, bo_ref,
                 ln1g_ref, ln1b_ref,
                 wi_ref, bi_ref, wo2_ref, bo2_ref,
                 ln2g_ref, ln2b_ref,
                 pw_ref, pb_ref,
                 o_ref, h_scr, *, normalize, dropout_p):
    l = pl.program_id(1)

    @pl.when(l == 0)
    def _():
        # seed the per-batch resident activation (embedding LN done as XLA glue)
        h_scr[...] = h0_ref[...]

    h = h_scr[...]                            # (S, H) f32, resident across layers

    # ---- fused QKV projection: (S, H) @ (H, 3H), bf16 in / f32 acc ----
    qkv = jnp.dot(h.astype(jnp.bfloat16), wqkv_ref[...],
                  preferred_element_type=jnp.float32) + bqkv_ref[...]
    scale = 1.0 / math.sqrt(HEAD_DIM)
    q = qkv[:, 0 * HIDDEN:1 * HIDDEN] * scale          # scale folded into Q once
    k = qkv[:, 1 * HIDDEN:2 * HIDDEN]
    v = qkv[:, 2 * HIDDEN:3 * HIDDEN]

    key_add = mask_ref[...]                   # (1, S) additive key mask for this batch

    # ---- per-head attention (statically unrolled); contexts gathered lane-wise ----
    ctx_parts = []
    for hh in range(N_HEADS):
        sl = slice(hh * HEAD_DIM, (hh + 1) * HEAD_DIM)
        q_h = q[:, sl].astype(jnp.bfloat16)
        k_h = k[:, sl].astype(jnp.bfloat16)
        v_h = v[:, sl].astype(jnp.bfloat16)
        s = jax.lax.dot_general(q_h, k_h, (((1,), (1,)), ((), ())),
                                preferred_element_type=jnp.float32)
        s = s + key_add                        # broadcast (1,S) over (S,S)
        s = s - jnp.max(s, axis=-1, keepdims=True)
        p = jnp.exp(s)
        p = p * pl.reciprocal(jnp.sum(p, axis=-1, keepdims=True), approx=True)
        ctx_parts.append(jnp.dot(p.astype(jnp.bfloat16), v_h,
                                 preferred_element_type=jnp.float32))
    ctx = jnp.concatenate(ctx_parts, axis=-1)  # (S, H)

    # ---- single K=128 output projection (full MXU contraction) ----
    attn = jnp.dot(ctx.astype(jnp.bfloat16), wo_ref[...],
                   preferred_element_type=jnp.float32) + bo_ref[...]

    h1 = _layernorm(attn + h, ln1g_ref[...], ln1b_ref[...])

    # ---- FFN ----
    f = jnp.dot(h1.astype(jnp.bfloat16), wi_ref[...],
                preferred_element_type=jnp.float32) + bi_ref[...]
    # TODO(synk): tanh-approx GELU; HuggingFace BERT uses exact erf-GELU.
    f = 0.5 * f * (1.0 + jnp.tanh(0.7978845608028654 * (f + 0.044715 * f * f * f)))
    f = jnp.dot(f.astype(jnp.bfloat16), wo2_ref[...],
                preferred_element_type=jnp.float32) + bo2_ref[...]

    h_new = _layernorm(f + h1, ln2g_ref[...], ln2b_ref[...])
    h_scr[...] = h_new

    # ---- fused pooler tail on the last layer step: dense + tanh (+ L2) + dropout ----
    @pl.when(l == N_LAYERS - 1)
    def _():
        cls = h_new[0:1, :]                    # (1, H) CLS row of this batch
        x = jnp.dot(cls.astype(jnp.bfloat16), pw_ref[...],
                    preferred_element_type=jnp.float32) + pb_ref[...]
        x = jnp.tanh(x)
        if normalize:
            # F.normalize: x / max(||x||_2, 1e-12) == x * rsqrt(max(sumsq, 1e-24))
            ss = jnp.sum(x * x, axis=-1, keepdims=True)
            x = x * jax.lax.rsqrt(jnp.maximum(ss, 1e-24))
        if dropout_p > 0.0:
            # TODO(synk): training-mode inverted dropout (nn.Dropout in eval mode
            # would be identity); uniforms come from jax.random in the wrapper.
            keep = (u_ref[...] >= dropout_p).astype(jnp.float32)
            x = x * keep * (1.0 / (1.0 - dropout_p))
        o_ref[...] = x


def _bert_pooled(params, h0, key_add, u, normalize, dropout_p):
    B, S, H = h0.shape

    def full2(shape):
        return pl.BlockSpec(shape, lambda b, l: (0, 0))

    def per_batch(shape):
        return pl.BlockSpec((None,) + shape, lambda b, l: (b, 0, 0))

    def per_layer(shape):
        return pl.BlockSpec((None,) + shape, lambda b, l: (l, 0, 0))

    out = pl.pallas_call(
        functools.partial(_bert_kernel, normalize=normalize, dropout_p=dropout_p),
        out_shape=jax.ShapeDtypeStruct((B, 1, H), jnp.float32),
        grid=(B, N_LAYERS),
        in_specs=[
            per_batch((S, H)),                  # h0 (post embedding-LN), per batch
            per_batch((1, S)),                  # additive key mask, per batch
            per_batch((1, H)),                  # dropout uniforms, per batch
            per_layer((H, 3 * H)),              # wqkv
            per_layer((1, 3 * H)),              # bqkv
            per_layer((H, H)),                  # wo
            per_layer((1, H)),                  # bo
            per_layer((1, H)),                  # ln1_g
            per_layer((1, H)),                  # ln1_b
            per_layer((H, INTERMEDIATE)),       # wi
            per_layer((1, INTERMEDIATE)),       # bi
            per_layer((INTERMEDIATE, H)),       # wo2
            per_layer((1, H)),                  # bo2
            per_layer((1, H)),                  # ln2_g
            per_layer((1, H)),                  # ln2_b
            full2((H, H)),                      # pool_w
            full2((1, H)),                      # pool_b
        ],
        out_specs=pl.BlockSpec((None, 1, H), lambda b, l: (b, 0, 0)),
        scratch_shapes=[pltpu.VMEM((S, H), jnp.float32)],   # resident activation
        compiler_params=pltpu.CompilerParams(
            dimension_semantics=("parallel", "arbitrary"),   # batch ∥ (v7x 2nd TC), layers serial
            vmem_limit_bytes=32 * 1024 * 1024),
    )(h0, key_add, u,
      params["wqkv"], params["bqkv"], params["wo"], params["bo"],
      params["ln1_g"], params["ln1_b"], params["wi"], params["bi"],
      params["wo2"], params["bo2"], params["ln2_g"], params["ln2_b"],
      params["pool_w"], params["pool_b"])
    return out.reshape(B, H)


# ---------------- parameter init (deterministic, synthetic) ----------------
def init_params(key):
    # TODO(synk): BertModel.from_pretrained checkpoint load replaced by
    # synthetic deterministic init.
    def nrm(k, shape):
        return 0.02 * jax.random.normal(k, shape, jnp.float32)

    keys = iter(jax.random.split(key, 32))
    p = {
        "word_emb": nrm(next(keys), (VOCAB, HIDDEN)),
        "pos_emb": nrm(next(keys), (MAX_POS, HIDDEN)),
        "type_emb": nrm(next(keys), (TYPE_VOCAB, HIDDEN)),
        "emb_ln_g": jnp.ones((1, HIDDEN), jnp.float32),
        "emb_ln_b": jnp.zeros((1, HIDDEN), jnp.float32),
        "pool_w": nrm(next(keys), (HIDDEN, HIDDEN)).astype(jnp.bfloat16),
        "pool_b": jnp.zeros((1, HIDDEN), jnp.float32),
    }
    wqkv, wo, wi, wo2 = [], [], [], []
    for _ in range(N_LAYERS):
        wq = nrm(next(keys), (HIDDEN, HIDDEN))
        wk = nrm(next(keys), (HIDDEN, HIDDEN))
        wv = nrm(next(keys), (HIDDEN, HIDDEN))
        wqkv.append(jnp.concatenate([wq, wk, wv], axis=1))   # fused QKV weight
        wo.append(nrm(next(keys), (HIDDEN, HIDDEN)))
        wi.append(nrm(next(keys), (HIDDEN, INTERMEDIATE)))
        wo2.append(nrm(next(keys), (INTERMEDIATE, HIDDEN)))
    p["wqkv"] = jnp.stack(wqkv).astype(jnp.bfloat16)          # (L, H, 3H)
    p["bqkv"] = jnp.zeros((N_LAYERS, 1, 3 * HIDDEN), jnp.float32)
    p["wo"] = jnp.stack(wo).astype(jnp.bfloat16)              # (L, H, H)
    p["bo"] = jnp.zeros((N_LAYERS, 1, HIDDEN), jnp.float32)
    p["ln1_g"] = jnp.ones((N_LAYERS, 1, HIDDEN), jnp.float32)
    p["ln1_b"] = jnp.zeros((N_LAYERS, 1, HIDDEN), jnp.float32)
    p["wi"] = jnp.stack(wi).astype(jnp.bfloat16)              # (L, H, I)
    p["bi"] = jnp.zeros((N_LAYERS, 1, INTERMEDIATE), jnp.float32)
    p["wo2"] = jnp.stack(wo2).astype(jnp.bfloat16)            # (L, I, H)
    p["bo2"] = jnp.zeros((N_LAYERS, 1, HIDDEN), jnp.float32)
    p["ln2_g"] = jnp.ones((N_LAYERS, 1, HIDDEN), jnp.float32)
    p["ln2_b"] = jnp.zeros((N_LAYERS, 1, HIDDEN), jnp.float32)
    return p


# ---------------- forward (mirrors BertSequenceEmbedding.forward) ----------------
def bert_sequence_embedding(params, input_ids, attention_mask=None,
                            token_type_ids=None, position_ids=None,
                            normalize=False, dropout_p=DROPOUT_P, dropout_seed=0):
    B, S = input_ids.shape
    if attention_mask is None:
        attention_mask = jnp.ones((B, S), jnp.float32)
    if token_type_ids is None:
        token_type_ids = jnp.zeros((B, S), jnp.int32)
    if position_ids is None:
        position_ids = jnp.broadcast_to(jnp.arange(S, dtype=jnp.int32), (B, S))

    # --- embeddings: gathers + sum + embedding LayerNorm are cheap XLA glue ---
    we = jnp.take(params["word_emb"], input_ids, axis=0)          # (B, S, H)
    pe = jnp.take(params["pos_emb"], position_ids, axis=0)
    te = jnp.take(params["type_emb"], token_type_ids, axis=0)
    h0 = _layernorm((we + pe + te).astype(jnp.float32),
                    params["emb_ln_g"], params["emb_ln_b"])        # (B, S, H)

    # --- per-batch additive key mask, (B, 1, S): no O((B*S)^2) tensor ---
    key_add = ((1.0 - attention_mask.astype(jnp.float32)) * -10000.0).reshape(B, 1, S)

    # dropout uniforms generated outside the kernel (portable across backends)
    u = jax.random.uniform(jax.random.PRNGKey(dropout_seed), (B, 1, HIDDEN),
                           jnp.float32)

    # --- fused encoder + pooler: one pallas_call, only (B, H) pooled hits HBM ---
    return _bert_pooled(params, h0, key_add, u, normalize, dropout_p)


if __name__ == "__main__":
    key = jax.random.PRNGKey(0)
    pkey, ikey = jax.random.split(key)
    params = init_params(pkey)

    B, S = 2, 8
    input_ids = jax.random.randint(ikey, (B, S), 0, VOCAB, dtype=jnp.int32)
    attention_mask = jnp.ones((B, S), jnp.float32)
    token_type_ids = jnp.zeros((B, S), jnp.int32)

    out = bert_sequence_embedding(params, input_ids, attention_mask,
                                  token_type_ids, normalize=False,
                                  dropout_p=DROPOUT_P, dropout_seed=42)
    out = jax.block_until_ready(out)
    assert out.shape == (B, HIDDEN) and out.dtype == jnp.float32
    print("KERNEL_OK")
</pallas_src>

<mosaic_0001>
module attributes {stable_mosaic.version = 11 : i64} {
  func.func @_bert_kernel(%arg0: i32, %arg1: i32, %arg2: memref<1x8x128xf32, #tpu.memory_space<vmem>>, %arg3: memref<1x1x8xf32, #tpu.memory_space<vmem>>, %arg4: memref<1x1x128xf32, #tpu.memory_space<vmem>>, %arg5: memref<1x128x384xbf16, #tpu.memory_space<vmem>>, %arg6: memref<1x1x384xf32, #tpu.memory_space<vmem>>, %arg7: memref<1x128x128xbf16, #tpu.memory_space<vmem>>, %arg8: memref<1x1x128xf32, #tpu.memory_space<vmem>>, %arg9: memref<1x1x128xf32, #tpu.memory_space<vmem>>, %arg10: memref<1x1x128xf32, #tpu.memory_space<vmem>>, %arg11: memref<1x128x256xbf16, #tpu.memory_space<vmem>>, %arg12: memref<1x1x256xf32, #tpu.memory_space<vmem>>, %arg13: memref<1x256x128xbf16, #tpu.memory_space<vmem>>, %arg14: memref<1x1x128xf32, #tpu.memory_space<vmem>>, %arg15: memref<1x1x128xf32, #tpu.memory_space<vmem>>, %arg16: memref<1x1x128xf32, #tpu.memory_space<vmem>>, %arg17: memref<128x128xbf16, #tpu.memory_space<vmem>>, %arg18: memref<1x128xf32, #tpu.memory_space<vmem>>, %arg19: memref<1x1x128xf32, #tpu.memory_space<vmem>>, %arg20: memref<8x128xf32, #tpu.memory_space<vmem>>) attributes {dimension_semantics = [#tpu.dimension_semantics<parallel>, #tpu.dimension_semantics<arbitrary>], iteration_bounds = array<i64: 2, 2>, scalar_prefetch = 0 : i64, scratch_operands = 1 : i64, tpu.core_type = #tpu.core_type<tc>, window_params = [{transform_indices = @transform_0, window_bounds = array<i64: 1, 8, 128>}, {transform_indices = @transform_1, window_bounds = array<i64: 1, 1, 8>}, {transform_indices = @transform_2, window_bounds = array<i64: 1, 1, 128>}, {transform_indices = @transform_3, window_bounds = array<i64: 1, 128, 384>}, {transform_indices = @transform_4, window_bounds = array<i64: 1, 1, 384>}, {transform_indices = @transform_5, window_bounds = array<i64: 1, 128, 128>}, {transform_indices = @transform_6, window_bounds = array<i64: 1, 1, 128>}, {transform_indices = @transform_7, window_bounds = array<i64: 1, 1, 128>}, {transform_indices = @transform_8, window_bounds = array<i64: 1, 1, 128>}, {transform_indices = @transform_9, window_bounds = array<i64: 1, 128, 256>}, {transform_indices = @transform_10, window_bounds = array<i64: 1, 1, 256>}, {transform_indices = @transform_11, window_bounds = array<i64: 1, 256, 128>}, {transform_indices = @transform_12, window_bounds = array<i64: 1, 1, 128>}, {transform_indices = @transform_13, window_bounds = array<i64: 1, 1, 128>}, {transform_indices = @transform_14, window_bounds = array<i64: 1, 1, 128>}, {pipeline_mode = #tpu.pipeline_mode<synchronous>, transform_indices = @transform_15, window_bounds = array<i64: 128, 128>}, {pipeline_mode = #tpu.pipeline_mode<synchronous>, transform_indices = @transform_16, window_bounds = array<i64: 1, 128>}, {transform_indices = @transform_17, window_bounds = array<i64: 1, 1, 128>}]} {
    %c0_i32 = arith.constant 0 : i32
    %0 = arith.cmpi eq, %arg1, %c0_i32 : i32
    %1 = arith.extui %0 : i1 to i32
    %c0_i32_0 = arith.constant 0 : i32
    %2 = arith.cmpi ne, %1, %c0_i32_0 : i32
    scf.if %2 {
      %c0_78 = arith.constant 0 : index
      %c0_79 = arith.constant 0 : index
      %c0_80 = arith.constant 0 : index
      %195 = vector.load %arg2[%c0_78, %c0_79, %c0_80] : memref<1x8x128xf32, #tpu.memory_space<vmem>>, vector<1x8x128xf32>
      %196 = vector.shape_cast %195 : vector<1x8x128xf32> to vector<8x128xf32>
      %c0_81 = arith.constant 0 : index
      %c0_82 = arith.constant 0 : index
      %197 = vector.load %arg20[%c0_81, %c0_82] : memref<8x128xf32, #tpu.memory_space<vmem>>, vector<8x128xf32>
      tpu.vector_store %arg20[%c0_81, %c0_82], %196 {strides = array<i32>} : memref<8x128xf32, #tpu.memory_space<vmem>>, vector<8x128xf32>,
    } else {
    }
    %c0 = arith.constant 0 : index
    %c0_1 = arith.constant 0 : index
    %3 = vector.load %arg20[%c0, %c0_1] : memref<8x128xf32, #tpu.memory_space<vmem>>, vector<8x128xf32>
    %4 = arith.truncf %3 : vector<8x128xf32> to vector<8x128xbf16>
    %c0_2 = arith.constant 0 : index
    %c0_3 = arith.constant 0 : index
    %c0_4 = arith.constant 0 : index
    %5 = vector.load %arg5[%c0_2, %c0_3, %c0_4] : memref<1x128x384xbf16, #tpu.memory_space<vmem>>, vector<1x128x384xbf16>
    %6 = vector.shape_cast %5 : vector<1x128x384xbf16> to vector<128x384xbf16>
    %cst = arith.constant dense<0.000000e+00> : vector<8x384xf32>
    %7 = tpu.matmul %4, %6, %cst {dimension_numbers = #tpu.dot_dimension_numbers<[1], [0], [0], [1], [0, 0, 1, 1], [], []>} : vector<8x128xbf16>, vector<128x384xbf16>, vector<8x384xf32> -> vector<8x384xf32>
    %c0_5 = arith.constant 0 : index
    %c0_6 = arith.constant 0 : index
    %c0_7 = arith.constant 0 : index
    %8 = vector.load %arg6[%c0_5, %c0_6, %c0_7] : memref<1x1x384xf32, #tpu.memory_space<vmem>>, vector<1x1x384xf32>
    %9 = vector.shape_cast %8 : vector<1x1x384xf32> to vector<1x384xf32>
    %10 = vector.broadcast %9 : vector<1x384xf32> to vector<8x384xf32>
    %11 = arith.addf %7, %10 : vector<8x384xf32>
    %12 = vector.extract_strided_slice %11 {offsets = [0, 0], sizes = [8, 128], strides = [1, 1]} : vector<8x384xf32> to vector<8x128xf32>
    %cst_8 = arith.constant 0.176776692 : f32
    %13 = vector.broadcast %cst_8 : f32 to vector<8x128xf32>
    %14 = arith.mulf %12, %13 : vector<8x128xf32>
    %15 = vector.extract_strided_slice %11 {offsets = [0, 128], sizes = [8, 128], strides = [1, 1]} : vector<8x384xf32> to vector<8x128xf32>
    %16 = vector.extract_strided_slice %11 {offsets = [0, 256], sizes = [8, 128], strides = [1, 1]} : vector<8x384xf32> to vector<8x128xf32>
    %c0_9 = arith.constant 0 : index
    %c0_10 = arith.constant 0 : index
    %c0_11 = arith.constant 0 : index
    %17 = vector.load %arg3[%c0_9, %c0_10, %c0_11] : memref<1x1x8xf32, #tpu.memory_space<vmem>>, vector<1x1x8xf32>
    %18 = vector.shape_cast %17 : vector<1x1x8xf32> to vector<1x8xf32>
    %19 = vector.extract_strided_slice %14 {offsets = [0, 0], sizes = [8, 32], strides = [1, 1]} : vector<8x128xf32> to vector<8x32xf32>
    %20 = arith.truncf %19 : vector<8x32xf32> to vector<8x32xbf16>
    %21 = vector.extract_strided_slice %15 {offsets = [0, 0], sizes = [8, 32], strides = [1, 1]} : vector<8x128xf32> to vector<8x32xf32>
    %22 = arith.truncf %21 : vector<8x32xf32> to vector<8x32xbf16>
    %23 = vector.extract_strided_slice %16 {offsets = [0, 0], sizes = [8, 32], strides = [1, 1]} : vector<8x128xf32> to vector<8x32xf32>
    %24 = arith.truncf %23 : vector<8x32xf32> to vector<8x32xbf16>
    %cst_12 = arith.constant dense<0.000000e+00> : vector<8x8xf32>
    %25 = tpu.matmul %20, %22, %cst_12 {dimension_numbers = #tpu.dot_dimension_numbers<[1], [1], [0], [0], [0, 0, 1, 0], [], []>} : vector<8x32xbf16>, vector<8x32xbf16>, vector<8x8xf32> -> vector<8x8xf32>
    %26 = vector.broadcast %18 : vector<1x8xf32> to vector<8x8xf32>
    %27 = arith.addf %25, %26 : vector<8x8xf32>
    %cst_13 = arith.constant dense<0xFF800000> : vector<8xf32>
    %28 = vector.multi_reduction <maximumf>, %27, %cst_13 [1] : vector<8x8xf32> to vector<8xf32>
    %29 = vector.shape_cast %28 : vector<8xf32> to vector<8x1xf32>
    %30 = vector.broadcast %29 : vector<8x1xf32> to vector<8x8xf32>
    %31 = arith.subf %27, %30 : vector<8x8xf32>
    %32 = math.exp %31 : vector<8x8xf32>
    %cst_14 = arith.constant dense<0.000000e+00> : vector<8xf32>
    %33 = vector.multi_reduction <add>, %32, %cst_14 [1] : vector<8x8xf32> to vector<8xf32>
    %34 = vector.shape_cast %33 : vector<8xf32> to vector<8x1xf32>
    %35 = tpu.reciprocal %34 {approx = true} : vector<8x1xf32> -> vector<8x1xf32>
    %36 = vector.broadcast %35 : vector<8x1xf32> to vector<8x8xf32>
    %37 = arith.mulf %32, %36 : vector<8x8xf32>
    %38 = arith.truncf %37 : vector<8x8xf32> to vector<8x8xbf16>
    %cst_15 = arith.constant dense<0.000000e+00> : vector<8x32xf32>
    %39 = tpu.matmul %38, %24, %cst_15 {dimension_numbers = #tpu.dot_dimension_numbers<[1], [0], [0], [1], [0, 0, 1, 1], [], []>} : vector<8x8xbf16>, vector<8x32xbf16>, vector<8x32xf32> -> vector<8x32xf32>
    %40 = vector.extract_strided_slice %14 {offsets = [0, 32], sizes = [8, 32], strides = [1, 1]} : vector<8x128xf32> to vector<8x32xf32>
    %41 = arith.truncf %40 : vector<8x32xf32> to vector<8x32xbf16>
    %42 = vector.extract_strided_slice %15 {offsets = [0, 32], sizes = [8, 32], strides = [1, 1]} : vector<8x128xf32> to vector<8x32xf32>
    %43 = arith.truncf %42 : vector<8x32xf32> to vector<8x32xbf16>
    %44 = vector.extract_strided_slice %16 {offsets = [0, 32], sizes = [8, 32], strides = [1, 1]} : vector<8x128xf32> to vector<8x32xf32>
    %45 = arith.truncf %44 : vector<8x32xf32> to vector<8x32xbf16>
    %cst_16 = arith.constant dense<0.000000e+00> : vector<8x8xf32>
    %46 = tpu.matmul %41, %43, %cst_16 {dimension_numbers = #tpu.dot_dimension_numbers<[1], [1], [0], [0], [0, 0, 1, 0], [], []>} : vector<8x32xbf16>, vector<8x32xbf16>, vector<8x8xf32> -> vector<8x8xf32>
    %47 = vector.broadcast %18 : vector<1x8xf32> to vector<8x8xf32>
    %48 = arith.addf %46, %47 : vector<8x8xf32>
    %cst_17 = arith.constant dense<0xFF800000> : vector<8xf32>
    %49 = vector.multi_reduction <maximumf>, %48, %cst_17 [1] : vector<8x8xf32> to vector<8xf32>
    %50 = vector.shape_cast %49 : vector<8xf32> to vector<8x1xf32>
    %51 = vector.broadcast %50 : vector<8x1xf32> to vector<8x8xf32>
    %52 = arith.subf %48, %51 : vector<8x8xf32>
    %53 = math.exp %52 : vector<8x8xf32>
    %cst_18 = arith.constant dense<0.000000e+00> : vector<8xf32>
    %54 = vector.multi_reduction <add>, %53, %cst_18 [1] : vector<8x8xf32> to vector<8xf32>
    %55 = vector.shape_cast %54 : vector<8xf32> to vector<8x1xf32>
    %56 = tpu.reciprocal %55 {approx = true} : vector<8x1xf32> -> vector<8x1xf32>
    %57 = vector.broadcast %56 : vector<8x1xf32> to vector<8x8xf32>
    %58 = arith.mulf %53, %57 : vector<8x8xf32>
    %59 = arith.truncf %58 : vector<8x8xf32> to vector<8x8xbf16>
    %cst_19 = arith.constant dense<0.000000e+00> : vector<8x32xf32>
    %60 = tpu.matmul %59, %45, %cst_19 {dimension_numbers = #tpu.dot_dimension_numbers<[1], [0], [0], [1], [0, 0, 1, 1], [], []>} : vector<8x8xbf16>, vector<8x32xbf16>, vector<8x32xf32> -> vector<8x32xf32>
    %61 = vector.extract_strided_slice %14 {offsets = [0, 64], sizes = [8, 32], strides = [1, 1]} : vector<8x128xf32> to vector<8x32xf32>
    %62 = arith.truncf %61 : vector<8x32xf32> to vector<8x32xbf16>
    %63 = vector.extract_strided_slice %15 {offsets = [0, 64], sizes = [8, 32], strides = [1, 1]} : vector<8x128xf32> to vector<8x32xf32>
    %64 = arith.truncf %63 : vector<8x32xf32> to vector<8x32xbf16>
    %65 = vector.extract_strided_slice %16 {offsets = [0, 64], sizes = [8, 32], strides = [1, 1]} : vector<8x128xf32> to vector<8x32xf32>
    %66 = arith.truncf %65 : vector<8x32xf32> to vector<8x32xbf16>
    %cst_20 = arith.constant dense<0.000000e+00> : vector<8x8xf32>
    %67 = tpu.matmul %62, %64, %cst_20 {dimension_numbers = #tpu.dot_dimension_numbers<[1], [1], [0], [0], [0, 0, 1, 0], [], []>} : vector<8x32xbf16>, vector<8x32xbf16>, vector<8x8xf32> -> vector<8x8xf32>
    %68 = vector.broadcast %18 : vector<1x8xf32> to vector<8x8xf32>
    %69 = arith.addf %67, %68 : vector<8x8xf32>
    %cst_21 = arith.constant dense<0xFF800000> : vector<8xf32>
    %70 = vector.multi_reduction <maximumf>, %69, %cst_21 [1] : vector<8x8xf32> to vector<8xf32>
    %71 = vector.shape_cast %70 : vector<8xf32> to vector<8x1xf32>
    %72 = vector.broadcast %71 : vector<8x1xf32> to vector<8x8xf32>
    %73 = arith.subf %69, %72 : vector<8x8xf32>
    %74 = math.exp %73 : vector<8x8xf32>
    %cst_22 = arith.constant dense<0.000000e+00> : vector<8xf32>
    %75 = vector.multi_reduction <add>, %74, %cst_22 [1] : vector<8x8xf32> to vector<8xf32>
    %76 = vector.shape_cast %75 : vector<8xf32> to vector<8x1xf32>
    %77 = tpu.reciprocal %76 {approx = true} : vector<8x1xf32> -> vector<8x1xf32>
    %78 = vector.broadcast %77 : vector<8x1xf32> to vector<8x8xf32>
    %79 = arith.mulf %74, %78 : vector<8x8xf32>
    %80 = arith.truncf %79 : vector<8x8xf32> to vector<8x8xbf16>
    %cst_23 = arith.constant dense<0.000000e+00> : vector<8x32xf32>
    %81 = tpu.matmul %80, %66, %cst_23 {dimension_numbers = #tpu.dot_dimension_numbers<[1], [0], [0], [1], [0, 0, 1, 1], [], []>} : vector<8x8xbf16>, vector<8x32xbf16>, vector<8x32xf32> -> vector<8x32xf32>
    %82 = vector.extract_strided_slice %14 {offsets = [0, 96], sizes = [8, 32], strides = [1, 1]} : vector<8x128xf32> to vector<8x32xf32>
    %83 = arith.truncf %82 : vector<8x32xf32> to vector<8x32xbf16>
    %84 = vector.extract_strided_slice %15 {offsets = [0, 96], sizes = [8, 32], strides = [1, 1]} : vector<8x128xf32> to vector<8x32xf32>
    %85 = arith.truncf %84 : vector<8x32xf32> to vector<8x32xbf16>
    %86 = vector.extract_strided_slice %16 {offsets = [0, 96], sizes = [8, 32], strides = [1, 1]} : vector<8x128xf32> to vector<8x32xf32>
    %87 = arith.truncf %86 : vector<8x32xf32> to vector<8x32xbf16>
    %cst_24 = arith.constant dense<0.000000e+00> : vector<8x8xf32>
    %88 = tpu.matmul %83, %85, %cst_24 {dimension_numbers = #tpu.dot_dimension_numbers<[1], [1], [0], [0], [0, 0, 1, 0], [], []>} : vector<8x32xbf16>, vector<8x32xbf16>, vector<8x8xf32> -> vector<8x8xf32>
    %89 = vector.broadcast %18 : vector<1x8xf32> to vector<8x8xf32>
    %90 = arith.addf %88, %89 : vector<8x8xf32>
    %cst_25 = arith.constant dense<0xFF800000> : vector<8xf32>
    %91 = vector.multi_reduction <maximumf>, %90, %cst_25 [1] : vector<8x8xf32> to vector<8xf32>
    %92 = vector.shape_cast %91 : vector<8xf32> to vector<8x1xf32>
    %93 = vector.broadcast %92 : vector<8x1xf32> to vector<8x8xf32>
    %94 = arith.subf %90, %93 : vector<8x8xf32>
    %95 = math.exp %94 : vector<8x8xf32>
    %cst_26 = arith.constant dense<0.000000e+00> : vector<8xf32>
    %96 = vector.multi_reduction <add>, %95, %cst_26 [1] : vector<8x8xf32> to vector<8xf32>
    %97 = vector.shape_cast %96 : vector<8xf32> to vector<8x1xf32>
    %98 = tpu.reciprocal %97 {approx = true} : vector<8x1xf32> -> vector<8x1xf32>
    %99 = vector.broadcast %98 : vector<8x1xf32> to vector<8x8xf32>
    %100 = arith.mulf %95, %99 : vector<8x8xf32>
    %101 = arith.truncf %100 : vector<8x8xf32> to vector<8x8xbf16>
    %cst_27 = arith.constant dense<0.000000e+00> : vector<8x32xf32>
    %102 = tpu.matmul %101, %87, %cst_27 {dimension_numbers = #tpu.dot_dimension_numbers<[1], [0], [0], [1], [0, 0, 1, 1], [], []>} : vector<8x8xbf16>, vector<8x32xbf16>, vector<8x32xf32> -> vector<8x32xf32>
    %103 = tpu.concatenate %39, %60, %81, %102 in 1 : vector<8x32xf32>, vector<8x32xf32>, vector<8x32xf32>, vector<8x32xf32> -> vector<8x128xf32>
    %104 = arith.truncf %103 : vector<8x128xf32> to vector<8x128xbf16>
    %c0_28 = arith.constant 0 : index
    %c0_29 = arith.constant 0 : index
    %c0_30 = arith.constant 0 : index
    %105 = vector.load %arg7[%c0_28, %c0_29, %c0_30] : memref<1x128x128xbf16, #tpu.memory_space<vmem>>, vector<1x128x128xbf16>
    %106 = vector.shape_cast %105 : vector<1x128x128xbf16> to vector<128x128xbf16>
    %cst_31 = arith.constant dense<0.000000e+00> : vector<8x128xf32>
    %107 = tpu.matmul %104, %106, %cst_31 {dimension_numbers = #tpu.dot_dimension_numbers<[1], [0], [0], [1], [0, 0, 1, 1], [], []>} : vector<8x128xbf16>, vector<128x128xbf16>, vector<8x128xf32> -> vector<8x128xf32>
    %c0_32 = arith.constant 0 : index
    %c0_33 = arith.constant 0 : index
    %c0_34 = arith.constant 0 : index
    %108 = vector.load %arg8[%c0_32, %c0_33, %c0_34] : memref<1x1x128xf32, #tpu.memory_space<vmem>>, vector<1x1x128xf32>
    %109 = vector.shape_cast %108 : vector<1x1x128xf32> to vector<1x128xf32>
    %110 = vector.broadcast %109 : vector<1x128xf32> to vector<8x128xf32>
    %111 = arith.addf %107, %110 : vector<8x128xf32>
    %112 = arith.addf %111, %3 : vector<8x128xf32>
    %c0_35 = arith.constant 0 : index
    %c0_36 = arith.constant 0 : index
    %c0_37 = arith.constant 0 : index
    %113 = vector.load %arg9[%c0_35, %c0_36, %c0_37] : memref<1x1x128xf32, #tpu.memory_space<vmem>>, vector<1x1x128xf32>
    %114 = vector.shape_cast %113 : vector<1x1x128xf32> to vector<1x128xf32>
    %c0_38 = arith.constant 0 : index
    %c0_39 = arith.constant 0 : index
    %c0_40 = arith.constant 0 : index
    %115 = vector.load %arg10[%c0_38, %c0_39, %c0_40] : memref<1x1x128xf32, #tpu.memory_space<vmem>>, vector<1x1x128xf32>
    %116 = vector.shape_cast %115 : vector<1x1x128xf32> to vector<1x128xf32>
    %cst_41 = arith.constant dense<0.000000e+00> : vector<8xf32>
    %117 = vector.multi_reduction <add>, %112, %cst_41 [1] : vector<8x128xf32> to vector<8xf32>
    %118 = vector.shape_cast %117 : vector<8xf32> to vector<8x1xf32>
    %cst_42 = arith.constant 1.280000e+02 : f32
    %119 = vector.broadcast %cst_42 : f32 to vector<8x1xf32>
    %120 = arith.divf %118, %119 : vector<8x1xf32>
    %121 = vector.broadcast %120 : vector<8x1xf32> to vector<8x128xf32>
    %122 = arith.subf %112, %121 : vector<8x128xf32>
    %123 = arith.mulf %122, %122 : vector<8x128xf32>
    %cst_43 = arith.constant dense<0.000000e+00> : vector<8xf32>
    %124 = vector.multi_reduction <add>, %123, %cst_43 [1] : vector<8x128xf32> to vector<8xf32>
    %125 = vector.shape_cast %124 : vector<8xf32> to vector<8x1xf32>
    %cst_44 = arith.constant 1.280000e+02 : f32
    %126 = vector.broadcast %cst_44 : f32 to vector<8x1xf32>
    %127 = arith.divf %125, %126 : vector<8x1xf32>
    %cst_45 = arith.constant 9.99999996E-13 : f32
    %128 = vector.broadcast %cst_45 : f32 to vector<8x1xf32>
    %129 = arith.addf %127, %128 : vector<8x1xf32>
    %130 = math.rsqrt %129 : vector<8x1xf32>
    %131 = vector.broadcast %130 : vector<8x1xf32> to vector<8x128xf32>
    %132 = arith.mulf %122, %131 : vector<8x128xf32>
    %133 = vector.broadcast %114 : vector<1x128xf32> to vector<8x128xf32>
    %134 = arith.mulf %132, %133 : vector<8x128xf32>
    %135 = vector.broadcast %116 : vector<1x128xf32> to vector<8x128xf32>
    %136 = arith.addf %134, %135 : vector<8x128xf32>
    %137 = arith.truncf %136 : vector<8x128xf32> to vector<8x128xbf16>
    %c0_46 = arith.constant 0 : index
    %c0_47 = arith.constant 0 : index
    %c0_48 = arith.constant 0 : index
    %138 = vector.load %arg11[%c0_46, %c0_47, %c0_48] : memref<1x128x256xbf16, #tpu.memory_space<vmem>>, vector<1x128x256xbf16>
    %139 = vector.shape_cast %138 : vector<1x128x256xbf16> to vector<128x256xbf16>
    %cst_49 = arith.constant dense<0.000000e+00> : vector<8x256xf32>
    %140 = tpu.matmul %137, %139, %cst_49 {dimension_numbers = #tpu.dot_dimension_numbers<[1], [0], [0], [1], [0, 0, 1, 1], [], []>} : vector<8x128xbf16>, vector<128x256xbf16>, vector<8x256xf32> -> vector<8x256xf32>
    %c0_50 = arith.constant 0 : index
    %c0_51 = arith.constant 0 : index
    %c0_52 = arith.constant 0 : index
    %141 = vector.load %arg12[%c0_50, %c0_51, %c0_52] : memref<1x1x256xf32, #tpu.memory_space<vmem>>, vector<1x1x256xf32>
    %142 = vector.shape_cast %141 : vector<1x1x256xf32> to vector<1x256xf32>
    %143 = vector.broadcast %142 : vector<1x256xf32> to vector<8x256xf32>
    %144 = arith.addf %140, %143 : vector<8x256xf32>
    %cst_53 = arith.constant 5.000000e-01 : f32
    %145 = vector.broadcast %cst_53 : f32 to vector<8x256xf32>
    %146 = arith.mulf %145, %144 : vector<8x256xf32>
    %cst_54 = arith.constant 4.471500e-02 : f32
    %147 = vector.broadcast %cst_54 : f32 to vector<8x256xf32>
    %148 = arith.mulf %147, %144 : vector<8x256xf32>
    %149 = arith.mulf %148, %144 : vector<8x256xf32>
    %150 = arith.mulf %149, %144 : vector<8x256xf32>
    %151 = arith.addf %144, %150 : vector<8x256xf32>
    %cst_55 = arith.constant 0.797884583 : f32
    %152 = vector.broadcast %cst_55 : f32 to vector<8x256xf32>
    %153 = arith.mulf %152, %151 : vector<8x256xf32>
    %154 = math.tanh %153 : vector<8x256xf32>
    %cst_56 = arith.constant 1.000000e+00 : f32
    %155 = vector.broadcast %cst_56 : f32 to vector<8x256xf32>
    %156 = arith.addf %155, %154 : vector<8x256xf32>
    %157 = arith.mulf %146, %156 : vector<8x256xf32>
    %158 = arith.truncf %157 : vector<8x256xf32> to vector<8x256xbf16>
    %c0_57 = arith.constant 0 : index
    %c0_58 = arith.constant 0 : index
    %c0_59 = arith.constant 0 : index
    %159 = vector.load %arg13[%c0_57, %c0_58, %c0_59] : memref<1x256x128xbf16, #tpu.memory_space<vmem>>, vector<1x256x128xbf16>
    %160 = vector.shape_cast %159 : vector<1x256x128xbf16> to vector<256x128xbf16>
    %cst_60 = arith.constant dense<0.000000e+00> : vector<8x128xf32>
    %161 = tpu.matmul %158, %160, %cst_60 {dimension_numbers = #tpu.dot_dimension_numbers<[1], [0], [0], [1], [0, 0, 1, 1], [], []>} : vector<8x256xbf16>, vector<256x128xbf16>, vector<8x128xf32> -> vector<8x128xf32>
    %c0_61 = arith.constant 0 : index
    %c0_62 = arith.constant 0 : index
    %c0_63 = arith.constant 0 : index
    %162 = vector.load %arg14[%c0_61, %c0_62, %c0_63] : memref<1x1x128xf32, #tpu.memory_space<vmem>>, vector<1x1x128xf32>
    %163 = vector.shape_cast %162 : vector<1x1x128xf32> to vector<1x128xf32>
    %164 = vector.broadcast %163 : vector<1x128xf32> to vector<8x128xf32>
    %165 = arith.addf %161, %164 : vector<8x128xf32>
    %166 = arith.addf %165, %136 : vector<8x128xf32>
    %c0_64 = arith.constant 0 : index
    %c0_65 = arith.constant 0 : index
    %c0_66 = arith.constant 0 : index
    %167 = vector.load %arg15[%c0_64, %c0_65, %c0_66] : memref<1x1x128xf32, #tpu.memory_space<vmem>>, vector<1x1x128xf32>
    %168 = vector.shape_cast %167 : vector<1x1x128xf32> to vector<1x128xf32>
    %c0_67 = arith.constant 0 : index
    %c0_68 = arith.constant 0 : index
    %c0_69 = arith.constant 0 : index
    %169 = vector.load %arg16[%c0_67, %c0_68, %c0_69] : memref<1x1x128xf32, #tpu.memory_space<vmem>>, vector<1x1x128xf32>
    %170 = vector.shape_cast %169 : vector<1x1x128xf32> to vector<1x128xf32>
    %cst_70 = arith.constant dense<0.000000e+00> : vector<8xf32>
    %171 = vector.multi_reduction <add>, %166, %cst_70 [1] : vector<8x128xf32> to vector<8xf32>
    %172 = vector.shape_cast %171 : vector<8xf32> to vector<8x1xf32>
    %cst_71 = arith.constant 1.280000e+02 : f32
    %173 = vector.broadcast %cst_71 : f32 to vector<8x1xf32>
    %174 = arith.divf %172, %173 : vector<8x1xf32>
    %175 = vector.broadcast %174 : vector<8x1xf32> to vector<8x128xf32>
    %176 = arith.subf %166, %175 : vector<8x128xf32>
    %177 = arith.mulf %176, %176 : vector<8x128xf32>
    %cst_72 = arith.constant dense<0.000000e+00> : vector<8xf32>
    %178 = vector.multi_reduction <add>, %177, %cst_72 [1] : vector<8x128xf32> to vector<8xf32>
    %179 = vector.shape_cast %178 : vector<8xf32> to vector<8x1xf32>
    %cst_73 = arith.constant 1.280000e+02 : f32
    %180 = vector.broadcast %cst_73 : f32 to vector<8x1xf32>
    %181 = arith.divf %179, %180 : vector<8x1xf32>
    %cst_74 = arith.constant 9.99999996E-13 : f32
    %182 = vector.broadcast %cst_74 : f32 to vector<8x1xf32>
    %183 = arith.addf %181, %182 : vector<8x1xf32>
    %184 = math.rsqrt %183 : vector<8x1xf32>
    %185 = vector.broadcast %184 : vector<8x1xf32> to vector<8x128xf32>
    %186 = arith.mulf %176, %185 : vector<8x128xf32>
    %187 = vector.broadcast %168 : vector<1x128xf32> to vector<8x128xf32>
    %188 = arith.mulf %186, %187 : vector<8x128xf32>
    %189 = vector.broadcast %170 : vector<1x128xf32> to vector<8x128xf32>
    %190 = arith.addf %188, %189 : vector<8x128xf32>
    %c0_75 = arith.constant 0 : index
    %c0_76 = arith.constant 0 : index
    %191 = vector.load %arg20[%c0_75, %c0_76] : memref<8x128xf32, #tpu.memory_space<vmem>>, vector<8x128xf32>
    tpu.vector_store %arg20[%c0_75, %c0_76], %190 {strides = array<i32>} : memref<8x128xf32, #tpu.memory_space<vmem>>, vector<8x128xf32>,
    %c1_i32 = arith.constant 1 : i32
    %192 = arith.cmpi eq, %arg1, %c1_i32 : i32
    %193 = arith.extui %192 : i1 to i32
    %c0_i32_77 = arith.constant 0 : i32
    %194 = arith.cmpi ne, %193, %c0_i32_77 : i32
    scf.if %194 {
      %195 = vector.extract_strided_slice %190 {offsets = [0, 0], sizes = [1, 128], strides = [1, 1]} : vector<8x128xf32> to vector<1x128xf32>
      %196 = arith.truncf %195 : vector<1x128xf32> to vector<1x128xbf16>
      %c0_78 = arith.constant 0 : index
      %c0_79 = arith.constant 0 : index
      %197 = vector.load %arg17[%c0_78, %c0_79] : memref<128x128xbf16, #tpu.memory_space<vmem>>, vector<128x128xbf16>
      %cst_80 = arith.constant dense<0.000000e+00> : vector<1x128xf32>
      %198 = tpu.matmul %196, %197, %cst_80 {dimension_numbers = #tpu.dot_dimension_numbers<[1], [0], [0], [1], [0, 0, 1, 1], [], []>} : vector<1x128xbf16>, vector<128x128xbf16>, vector<1x128xf32> -> vector<1x128xf32>
      %c0_81 = arith.constant 0 : index
      %c0_82 = arith.constant 0 : index
      %199 = vector.load %arg18[%c0_81, %c0_82] : memref<1x128xf32, #tpu.memory_space<vmem>>, vector<1x128xf32>
      %200 = arith.addf %198, %199 : vector<1x128xf32>
      %201 = math.tanh %200 : vector<1x128xf32>
      %c0_83 = arith.constant 0 : index
      %c0_84 = arith.constant 0 : index
      %c0_85 = arith.constant 0 : index
      %202 = vector.load %arg4[%c0_83, %c0_84, %c0_85] : memref<1x1x128xf32, #tpu.memory_space<vmem>>, vector<1x1x128xf32>
      %203 = vector.shape_cast %202 : vector<1x1x128xf32> to vector<1x128xf32>
      %cst_86 = arith.constant 1.000000e-01 : f32
      %204 = vector.broadcast %cst_86 : f32 to vector<1x128xf32>
      %205 = arith.cmpf oge, %203, %204 : vector<1x128xf32>
      %206 = arith.extui %205 : vector<1x128xi1> to vector<1x128xi32>
      %207 = arith.sitofp %206 : vector<1x128xi32> to vector<1x128xf32>
      %208 = arith.mulf %201, %207 : vector<1x128xf32>
      %cst_87 = arith.constant 1.11111116 : f32
      %209 = vector.broadcast %cst_87 : f32 to vector<1x128xf32>
      %210 = arith.mulf %208, %209 : vector<1x128xf32>
      %c0_88 = arith.constant 0 : index
      %c0_89 = arith.constant 0 : index
      %c0_90 = arith.constant 0 : index
      %211 = vector.load %arg19[%c0_88, %c0_89, %c0_90] : memref<1x1x128xf32, #tpu.memory_space<vmem>>, vector<1x1x128xf32>
      %212 = vector.shape_cast %211 : vector<1x1x128xf32> to vector<1x128xf32>
      %213 = vector.shape_cast %210 : vector<1x128xf32> to vector<1x1x128xf32>
      tpu.vector_store %arg19[%c0_88, %c0_89, %c0_90], %213 {strides = array<i32>} : memref<1x1x128xf32, #tpu.memory_space<vmem>>, vector<1x1x128xf32>,
    } else {
    }
    return
  }
  func.func @transform_0(%arg0: i32, %arg1: i32) -> (i32, i32, i32) {
    %c0_i32 = arith.constant 0 : i32
    %c0_i32_0 = arith.constant 0 : i32
    %c0_i32_1 = arith.constant 0 : i32
    return %arg0, %c0_i32, %c0_i32_0 : i32, i32, i32
  }
  func.func @transform_1(%arg0: i32, %arg1: i32) -> (i32, i32, i32) {
    %c0_i32 = arith.constant 0 : i32
    %c0_i32_0 = arith.constant 0 : i32
    %c0_i32_1 = arith.constant 0 : i32
    return %arg0, %c0_i32, %c0_i32_0 : i32, i32, i32
  }
  func.func @transform_2(%arg0: i32, %arg1: i32) -> (i32, i32, i32) {
    %c0_i32 = arith.constant 0 : i32
    %c0_i32_0 = arith.constant 0 : i32
    %c0_i32_1 = arith.constant 0 : i32
    return %arg0, %c0_i32, %c0_i32_0 : i32, i32, i32
  }
  func.func @transform_3(%arg0: i32, %arg1: i32) -> (i32, i32, i32) {
    %c0_i32 = arith.constant 0 : i32
    %c0_i32_0 = arith.constant 0 : i32
    %c0_i32_1 = arith.constant 0 : i32
    return %arg1, %c0_i32, %c0_i32_0 : i32, i32, i32
  }
  func.func @transform_4(%arg0: i32, %arg1: i32) -> (i32, i32, i32) {
    %c0_i32 = arith.constant 0 : i32
    %c0_i32_0 = arith.constant 0 : i32
    %c0_i32_1 = arith.constant 0 : i32
    return %arg1, %c0_i32, %c0_i32_0 : i32, i32, i32
  }
  func.func @transform_5(%arg0: i32, %arg1: i32) -> (i32, i32, i32) {
    %c0_i32 = arith.constant 0 : i32
    %c0_i32_0 = arith.constant 0 : i32
    %c0_i32_1 = arith.constant 0 : i32
    return %arg1, %c0_i32, %c0_i32_0 : i32, i32, i32
  }
  func.func @transform_6(%arg0: i32, %arg1: i32) -> (i32, i32, i32) {
    %c0_i32 = arith.constant 0 : i32
    %c0_i32_0 = arith.constant 0 : i32
    %c0_i32_1 = arith.constant 0 : i32
    return %arg1, %c0_i32, %c0_i32_0 : i32, i32, i32
  }
  func.func @transform_7(%arg0: i32, %arg1: i32) -> (i32, i32, i32) {
    %c0_i32 = arith.constant 0 : i32
    %c0_i32_0 = arith.constant 0 : i32
    %c0_i32_1 = arith.constant 0 : i32
    return %arg1, %c0_i32, %c0_i32_0 : i32, i32, i32
  }
  func.func @transform_8(%arg0: i32, %arg1: i32) -> (i32, i32, i32) {
    %c0_i32 = arith.constant 0 : i32
    %c0_i32_0 = arith.constant 0 : i32
    %c0_i32_1 = arith.constant 0 : i32
    return %arg1, %c0_i32, %c0_i32_0 : i32, i32, i32
  }
  func.func @transform_9(%arg0: i32, %arg1: i32) -> (i32, i32, i32) {
    %c0_i32 = arith.constant 0 : i32
    %c0_i32_0 = arith.constant 0 : i32
    %c0_i32_1 = arith.constant 0 : i32
    return %arg1, %c0_i32, %c0_i32_0 : i32, i32, i32
  }
  func.func @transform_10(%arg0: i32, %arg1: i32) -> (i32, i32, i32) {
    %c0_i32 = arith.constant 0 : i32
    %c0_i32_0 = arith.constant 0 : i32
    %c0_i32_1 = arith.constant 0 : i32
    return %arg1, %c0_i32, %c0_i32_0 : i32, i32, i32
  }
  func.func @transform_11(%arg0: i32, %arg1: i32) -> (i32, i32, i32) {
    %c0_i32 = arith.constant 0 : i32
    %c0_i32_0 = arith.constant 0 : i32
    %c0_i32_1 = arith.constant 0 : i32
    return %arg1, %c0_i32, %c0_i32_0 : i32, i32, i32
  }
  func.func @transform_12(%arg0: i32, %arg1: i32) -> (i32, i32, i32) {
    %c0_i32 = arith.constant 0 : i32
    %c0_i32_0 = arith.constant 0 : i32
    %c0_i32_1 = arith.constant 0 : i32
    return %arg1, %c0_i32, %c0_i32_0 : i32, i32, i32
  }
  func.func @transform_13(%arg0: i32, %arg1: i32) -> (i32, i32, i32) {
    %c0_i32 = arith.constant 0 : i32
    %c0_i32_0 = arith.constant 0 : i32
    %c0_i32_1 = arith.constant 0 : i32
    return %arg1, %c0_i32, %c0_i32_0 : i32, i32, i32
  }
  func.func @transform_14(%arg0: i32, %arg1: i32) -> (i32, i32, i32) {
    %c0_i32 = arith.constant 0 : i32
    %c0_i32_0 = arith.constant 0 : i32
    %c0_i32_1 = arith.constant 0 : i32
    return %arg1, %c0_i32, %c0_i32_0 : i32, i32, i32
  }
  func.func @transform_15(%arg0: i32, %arg1: i32) -> (i32, i32) {
    %c0_i32 = arith.constant 0 : i32
    %c0_i32_0 = arith.constant 0 : i32
    %c0_i32_1 = arith.constant 0 : i32
    return %c0_i32, %c0_i32_0 : i32, i32
  }
  func.func @transform_16(%arg0: i32, %arg1: i32) -> (i32, i32) {
    %c0_i32 = arith.constant 0 : i32
    %c0_i32_0 = arith.constant 0 : i32
    %c0_i32_1 = arith.constant 0 : i32
    return %c0_i32, %c0_i32_0 : i32, i32
  }
  func.func @transform_17(%arg0: i32, %arg1: i32) -> (i32, i32, i32) {
    %c0_i32 = arith.constant 0 : i32
    %c0_i32_0 = arith.constant 0 : i32
    %c0_i32_1 = arith.constant 0 : i32
    return %arg0, %c0_i32, %c0_i32_0 : i32, i32, i32
  }
}

</mosaic_0001>

<bundles_post_ra>
// kernel: tpu_custom_call.1
= control target key start
LH: loop header
LB: loop body
LE: loop exit
PB: predicated region body
PF: predicated region fallthrough
CT: control target
= control target key end

     0   :  { %s4468_s0 = inlined_call_operand.hbm [shape: f32[2,8,128], index: 0, kind: input, shape index: {}]   ;;  %s4469_s1 = inlined_call_operand.hbm [shape: f32[2,1,8], index: 1, kind: input, shape index: {}]   ;;  %s4470_s2 = inlined_call_operand.hbm [shape: f32[2,1,128], index: 2, kind: input, shape index: {}]   ;;  %s4471_s3 = inlined_call_operand.hbm [shape: bf16[2,128,384], index: 3, kind: input, shape index: {}]   ;;  %s4472_s4 = inlined_call_operand.vmem [shape: f32[2,1,384], index: 4, kind: input, shape index: {}]   ;;  %s4473_s5 = inlined_call_operand.hbm [shape: bf16[2,128,128], index: 5, kind: input, shape index: {}]   ;;  %s4474_s6 = inlined_call_operand.vmem [shape: f32[2,1,128], index: 6, kind: input, shape index: {}]   ;;  %s4475_s7 = inlined_call_operand.vmem [shape: f32[2,1,128], index: 7, kind: input, shape index: {}]   ;;  %s4476_s8 = inlined_call_operand.vmem [shape: f32[2,1,128], index: 8, kind: input, shape index: {}]   ;;  %s4477_s9 = inlined_call_operand.hbm [shape: bf16[2,128,256], index: 9, kind: input, shape index: {}]   ;;  %s4478_s10 = inlined_call_operand.vmem [shape: f32[2,1,256], index: 10, kind: input, shape index: {}]   ;;  %s4479_s11 = inlined_call_operand.hbm [shape: bf16[2,256,128], index: 11, kind: input, shape index: {}]   ;;  %s4480_s12 = inlined_call_operand.vmem [shape: f32[2,1,128], index: 12, kind: input, shape index: {}]   ;;  %s4481_s13 = inlined_call_operand.vmem [shape: f32[2,1,128], index: 13, kind: input, shape index: {}]   ;;  %s4482_s14 = inlined_call_operand.vmem [shape: f32[2,1,128], index: 14, kind: input, shape index: {}]   ;;  %s4483_s15 = inlined_call_operand.hbm [shape: bf16[128,128], index: 15, kind: input, shape index: {}]   ;;  %s4484_s16 = inlined_call_operand.vmem [shape: f32[1,128], index: 16, kind: input, shape index: {}]   ;;  %s4485_s17 = inlined_call_operand.hbm [shape: f32[2,1,128], index: 17, kind: output, shape index: {}]  }
   0x1   :  { %4538 = sst [smem:[#allocation43_spill]] %s4468_s0 }
   0x2   :  { %4539 = sst [smem:[#allocation44_spill]] %s4469_s1 }
   0x3   :  { %4540 = sst [smem:[#allocation45_spill]] %s4470_s2 }
   0x4   :  { %4541 = sst [smem:[#allocation46_spill]] %s4471_s3 }
   0x5   :  { %4542 = sst [smem:[#allocation47_spill]] %s4472_s4 }
   0x6   :  { %4543 = sst [smem:[#allocation48_spill]] %s4473_s5 }
   0x7   :  { %4544 = sst [smem:[#allocation49_spill]] %s4474_s6 }
   0x8   :  { %4545 = sst [smem:[#allocation50_spill]] %s4475_s7 }
   0x9   :  { %4546 = sst [smem:[#allocation51_spill]] %s4476_s8 }
   0xa   :  { %4547 = sst [smem:[#allocation52_spill]] %s4477_s9 }
   0xb   :  { %4548 = sst [smem:[#allocation53_spill]] %s4478_s10 }
   0xc   :  { %4549 = sst [smem:[#allocation54_spill]] %s4479_s11 }
   0xd   :  { %4550 = sst [smem:[#allocation55_spill]] %s4480_s12 }
   0xe   :  { %4551 = sst [smem:[#allocation56_spill]] %s4481_s13 }
   0xf   :  { %4552 = sst [smem:[#allocation57_spill]] %s4482_s14 }
  0x10   :  { %4553 = sst [smem:[#allocation58_spill]] %s4483_s15 }
  0x11   :  { %4554 = sst [smem:[#allocation59_spill]] %s4484_s16 }
  0x12   :  { %4555 = sst [smem:[#allocation60_spill]] %s4485_s17 }
  0x13   :  { %22 = vsyncpa [#allocation4], 0 }
  0x14   :  { %24 = vsyncpa [#allocation4 + $0x1], 0 }
  0x15   :  { %25 = vsyncpa [#allocation7], 0 }
  0x16   :  { %27 = vsyncpa [#allocation7 + $0x1], 0 }
  0x17   :  { %28 = vsyncpa [#allocation10], 0 }
  0x18   :  { %30 = vsyncpa [#allocation10 + $0x1], 0 }
  0x19   :  { %31 = vsyncpa [#allocation13], 0 }
  0x1a   :  { %33 = vsyncpa [#allocation13 + $0x1], 0 }
  0x1b   :  { %34 = vsyncpa [#allocation16], 0 }
  0x1c   :  { %35 = vsyncpa [#allocation5], 0 }
  0x1d   :  { %37 = vsyncpa [#allocation5 + $0x1], 0  ;;  %s3657_s24 = smov 0   ;;  %s3659_s25 = smov 0  }
  0x1e   :  { %s3661_s26 = smov 0   ;;  %s3663_s27 = smov 0  }
  0x1f   :  { %s3665_s28 = smov 0   ;;  %s3667_s29 = smov 0  }
  0x20   :  { %s3669_s0 = smov 0   ;;  %s3671_s30 = smov 0  }
  0x21   :  { %s3673_s18 = smov 0   ;;  %s3675_s19 = smov 0  }
  0x22   :  { %s3677_s1 = smov 0  }
  0x23 LB: > { %4556 = sst [smem:[#allocation24_spill]] %s3506_s25  ;;  %s3713_s20 = sadd.s32 4294967295, %s3542_s1   ;;  %s3542_s1 = sphi %s3677_s1, %s43_s1   ;;  %s3538_s19 = sphi %s3675_s19, %s4662_s19   ;;  %s3534_s18 = sphi %s3673_s18, %s4661_s18   ;;  %s3530_s30 = sphi %s3671_s30, %s4660_s30   ;;  %s3526_s0 = sphi %s3669_s0, %s4659_s0   ;;  %s3522_s29 = sphi %s3667_s29, %s4658_s29   ;;  %s3518_s28 = sphi %s3665_s28, %s4664_s28   ;;  %s3514_s27 = sphi %s3663_s27, %s4663_s27   ;;  %s3510_s26 = sphi %s3661_s26, %s4656_s26   ;;  %s3506_s25 = sphi %s3659_s25, %s4655_s25   ;;  %s3502_s24 = sphi %s3657_s24, %s4654_s24  }
  0x24   : > { %4557 = sst [smem:[#allocation25_spill]] %s3510_s26  ;;  %s2597_s21 = sadd.s32 4294967294, %s3542_s1  }
  0x25   : > { %4558 = sst [smem:[#allocation26_spill]] %s3514_s27  ;;  %p69_p0 = scmp.ne.s32.totalorder %s3522_s29, %s3518_s28 }
  0x26   : > { %4559 = sst [smem:[#allocation27_spill]] %s3522_s29  ;;  %p70_p1 = scmp.eq.s32.totalorder %s3542_s1, 0 }
  0x27   : > { %4560 = sst [smem:[#allocation28_spill]] %s3526_s0  ;;  %p4496_p2 = scmp.ne.s32.totalorder %s3518_s28, %s3514_s27 }
  0x28   : > { %4561 = sst [smem:[#allocation29_spill]] %s3530_s30  ;;  %p71_p3 = por %p70_p1, %p69_p0 }
  0x29   : > { %4562 = sst [smem:[#allocation30_spill]] %s3534_s18  ;;  %p147_p4 = scmp.ne.s32.totalorder %s3510_s26, %s3506_s25 }
  0x2a   : > { %4563 = sst [smem:[#allocation31_spill]] %s3538_s19  ;;  %p505_p6 = scmp.eq.s32.totalorder %s3713_s20, 3 }
  0x2b   : > { %4564 = sst [smem:[#allocation32_spill]] %s3542_s1  ;;  %p3729_p7 = por %p147_p4, %p70_p1 }
  0x2c   : > { %p511_p8 = scmp.eq.s32.totalorder %s2597_s21, 3  ;;  %p3733_p9 = por %p505_p6, %p69_p0 }
  0x2d   : > { %s4565_s30 = scalar_select %p3729_p7, 1, 0 }
  0x2e   : > { %s4566_s16 = scalar_select %p3733_p9, 1, 0 }
  0x2f   : > { %p3740_p10 = por %p511_p8, %p4496_p2  ;;  %p4497_p11 = scmp.lt.s32.totalorder %s3542_s1, 4 }
  0x30   : > { %4567 = sst [smem:[#allocation33_spill]] %s4566_s16  ;;  %s3746_s17 = sand.u32 1, %s3522_s29  }
  0x31   : > { %s4568_s23 = scalar_select %p3740_p10, 1, 0 }
  0x32   : > { %s3749_s22 = sand.u32 1, %s3542_s1   ;;  %p3753_p12 = pnand %p4497_p11, %p71_p3 }
  0x33   : > { %4569 = sst [smem:[#allocation34_spill]] %s4568_s23  ;;  %s2603_s21 = sshll.u32 %s3538_s19, 4 }
  0x34   : > { %s4570_s14 = scalar_select %p3753_p12, 1, 0 }
  0x35   : > { %s568_s16 = scalar_lea.vmem [#allocation6], %s3746_s17  ;;  %s4572_s4 = sld [smem:[#allocation44_spill]] }
  0x36   : > { %4571 = sst [smem:[#allocation35_spill]] %s4570_s14  ;;  %s575_s13 = sshll.u32 %s568_s16, 4  ;;  %s3764_s13 = int_to_ptr.vmem [resolvable:$true] %s575_s13 }
  0x37   : > { %s4573_s2 = sld [smem:[#allocation45_spill]]  ;;  %s4499_s0 = scalar_lea.sflag [#allocation7], %s3749_s22 }
  0x38   : > { %p3776_p0 = pneg %p3753_p12 }
  0x3a   : > { %s4575_s16 = scalar_select %p3776_p0, 1, 0 }
  0x3b   : > { %s3762_s23 = scalar_lea.hbm %s4572_s4, %s2603_s21  ;;  %s3171_s15 = scalar_lea.hbm %s4572_s4, 32 }
  0x3c   : > { %s3166_s5 = scalar_lea.hbm %s3762_s23, 16  ;;  %p3172_p4 = scmp.lt.u32.totalorder %s3762_s23, %s4572_s4 }
  0x3d   : > { %s3769_s6 = scalar_lea.hbm %s4573_s2, %s2603_s21  ;;  %p3167_p13 = scmp.ne.s32.totalorder %s3762_s23, %s3166_s5 }
  0x3e   : > { %4574 = sst [smem:[#allocation36_spill]] %s3769_s6  ;;  %p3173_p6 = scmp.lt.u32.totalorder %s3171_s15, %s3166_s5 }
  0x3f   : > { %p3169_p1 = pnand %p3776_p0, %p3167_p13  ;;  %p3175_p5 = scmp.lt.u32.totalorder %s3166_s5, %s3762_s23 }
  0x40   : > { %p3174_p8 = por %p3173_p6, %p3172_p4 }
  0x41   : > { %p3170_p3 = pneg %p3169_p1 }
  0x42   : > { %p3176_p2 = por %p3175_p5, %p3174_p8 }
  0x44   : > { %p3177_p11 = pnand %p3176_p2, %p3170_p3 }
  0x46   : > { %3180 = shalt.err (!%p3177_p11)
}
  0x47   : > { %s3181_s8 = scalar_lea.vmem %s3764_s13, 16  ;;  %s3544_s21 = smov [#allocation6]  }
  0x48   : > { %p3182_p13 = scmp.ne.s32.totalorder %s3764_s13, %s3181_s8  ;;  %s3186_s10 = sshll.u32 %s3544_s21, 4  ;;  %s3187_s10 = int_to_ptr.vmem [resolvable:$false] %s3186_s10 }
  0x49   : > { %s3188_s11 = scalar_lea.vmem %s3187_s10, 32  ;;  %p3189_p9 = scmp.lt.s32.totalorder %s3764_s13, %s3187_s10 }
  0x4a   : > { %p3184_p1 = pnand %p3182_p13, %p3776_p0  ;;  %p3190_p7 = scmp.lt.s32.totalorder %s3188_s11, %s3181_s8 }
  0x4c   : > { %p3185_p10 = pneg %p3184_p1  ;;  %p3191_p4 = por %p3190_p7, %p3189_p9 }
  0x4e   : > { %p3192_p6 = pnand %p3191_p4, %p3185_p10 }
  0x50   : > { %3195 = shalt.err (!%p3192_p6)
}
  0x51   : > { %2925 = dma.hbm_to_vmem [thread:$0]  (!%p3753_p12), %s3762_s23, 16, %s3764_s13, %s4499_s0  }
  0x52   : > { %p4576_p2 = scmp.ne.s32.totalorder %s4565_s30, 0  ;;  %p4577_p5 = scmp.lt.s32.totalorder %s3542_s1, 4 }
  0x53   : > { %s52_s15 = sadd.s32 1, %s3534_s18  ;;  %s3811_s12 = sand.u32 1, %s3510_s26  }
  0x54   : > { %p3805_p7 = pnand %p4577_p5, %p4576_p2  ;;  %p53_p9 = scmp.ge.s32.totalorder %s52_s15, 2 }
  0x55   : > { %s2891_s7 = smul.u32 192, %s3811_s12  ;;  %s4580_s13 = sadd.s32 1, %s3538_s19 }
  0x56   : > { %s4578_s5 = scalar_select %p3805_p7, 1, 0 }
  0x57   : > { %s2892_s8 = smul.u32 3072, %s3534_s18  ;;  %s4666_s15 = smov (%p53_p9, %s52_s15), 0 }
  0x58   : > { %4579 = sst [smem:[#allocation37_spill]] %s4666_s15  ;;  %s4668_s13 = smov (!%p53_p9, %s4580_s13), %s3538_s19 }
  0x59   : > { %s137_s30 = ssub.s32 %s3534_s18, %s4666_s15  ;;  %p57_p10 = scmp.ge.s32.totalorder %s4668_s13, 2 }
  0x5a   : > { %p138_p11 = scmp.eq.s32.totalorder %s137_s30, 0  ;;  %s4581_s3 = sld [smem:[#allocation46_spill]] }
  0x5b   : > { %s603_s11 = scalar_lea.vmem [#allocation9], %s2891_s7  ;;  %s4670_s13 = smov (%p57_p10, %s4668_s13), 0 }
  0x5c   : > { %s610_s0 = sshll.u32 %s603_s11, 4  ;;  %4582 = sst [smem:[#allocation38_spill]] %s4670_s13  ;;  %s3836_s0 = int_to_ptr.vmem [resolvable:$true] %s610_s0 }
  0x5d   : > { %s4583_s4 = sadd.s32 1, %s3510_s26  ;;  %s59_s15 = ssub.s32 %s3538_s19, %s4670_s13 }
  0x5e   : > { %s3832_s2 = scalar_select %p138_p11, %s3510_s26, %s4583_s4  }
  0x5f   : > { %p3838_p3 = scmp.eq.s32.totalorder %s59_s15, 0  ;;  %p3847_p13 = pneg %p3805_p7 }
  0x60   : > { %s3825_s10 = scalar_lea.hbm %s4581_s3, %s2892_s8  ;;  %4584 = sst [smem:[#allocation39_spill]] %s3832_s2 }
  0x61   : > { %s4585_s30 = scalar_select %p3838_p3, 1, 0 }
  0x62   : > { %s3196_s23 = scalar_lea.hbm %s3825_s10, 3072  ;;  %s3201_s11 = scalar_lea.hbm %s4581_s3, 6144 }
  0x63   : > { %p3197_p8 = scmp.ne.s32.totalorder %s3825_s10, %s3196_s23  ;;  %p3202_p6 = scmp.lt.u32.totalorder %s3825_s10, %s4581_s3 }
  0x64   : > { %s4586_s7 = scalar_select %p3847_p13, 1, 0 }
  0x65   : > { %p3199_p1 = pnand %p3847_p13, %p3197_p8  ;;  %p3203_p2 = scmp.lt.u32.totalorder %s3201_s11, %s3196_s23 }
  0x66   : > { %p3205_p9 = scmp.lt.u32.totalorder %s3196_s23, %s3825_s10 }
  0x67   : > { %p3200_p4 = pneg %p3199_p1  ;;  %p3204_p5 = por %p3203_p2, %p3202_p6 }
  0x69   : > { %p3206_p10 = por %p3205_p9, %p3204_p5 }
  0x6b   : > { %p3207_p11 = pnand %p3206_p10, %p3200_p4 }
  0x6d   : > { %3210 = shalt.err (!%p3207_p11)
}
  0x6e   : > { %s3211_s8 = scalar_lea.vmem %s3836_s0, 3072  ;;  %s3545_s4 = smov [#allocation9]  }
  0x6f   : > { %p3212_p8 = scmp.ne.s32.totalorder %s3836_s0, %s3211_s8  ;;  %s3216_s21 = sshll.u32 %s3545_s4, 4  ;;  %s3217_s21 = int_to_ptr.vmem [resolvable:$false] %s3216_s21 }
  0x70   : > { %s3218_s13 = scalar_lea.vmem %s3217_s21, 6144  ;;  %p3219_p0 = scmp.lt.s32.totalorder %s3836_s0, %s3217_s21 }
  0x71   : > { %p3214_p1 = pnand %p3212_p8, %p3847_p13  ;;  %p3220_p3 = scmp.lt.s32.totalorder %s3218_s13, %s3211_s8 }
  0x73   : > { %p3215_p12 = pneg %p3214_p1  ;;  %p3221_p6 = por %p3220_p3, %p3219_p0 }
  0x75   : > { %p3222_p2 = pnand %p3221_p6, %p3215_p12 }
  0x77   : > { %3225 = shalt.err (!%p3222_p2)
}
  0x78   : > { %s3546_s23 = smov 192   ;;  %s3547_s11 = smov 12  }
  0x79   : > { %s4587_s8 = scalar_lea.sflag [#allocation10], %s3749_s22  ;;  %s4588_s15 = sadd.s32 1, %s3522_s29 }
  0x7a   : > { %2931 = dma.hbm_to_vmem [thread:$0]  (!%p3805_p7), %s3825_s10, 3072, %s3836_s0, %s4587_s8, %s3546_s23, %s3546_s23, %s3547_s11  }
  0x7b   : > { %p4589_p12 = scmp.ne.s32.totalorder %s4585_s30, 0  ;;  %s2609_s21 = sshll.u32 %s3811_s12, 7 }
  0x7c   : > { %s2716_s13 = sshll.u32 %s3534_s18, 11  ;;  %s4591_s9 = sld [smem:[#allocation52_spill]] }
  0x7d   : > { %s3877_s4 = scalar_select %p4589_p12, %s3522_s29, %s4588_s15  }
  0x7e   : > { %s670_s6 = scalar_lea.vmem [#allocation12], %s2609_s21  ;;  %s4512_s0 = scalar_lea.sflag [#allocation13], %s3749_s22 }
  0x7f   : > { %4590 = sst [smem:[#allocation40_spill]] %s3877_s4  ;;  %s677_s14 = sshll.u32 %s670_s6, 4  ;;  %s3890_s14 = int_to_ptr.vmem [resolvable:$true] %s677_s14 }
  0x82   : > { %s3886_s26 = scalar_lea.hbm %s4591_s9, %s2716_s13  ;;  %s3231_s2 = scalar_lea.hbm %s4591_s9, 4096 }
  0x83   : > { %s3226_s10 = scalar_lea.hbm %s3886_s26, 2048  ;;  %p3232_p5 = scmp.lt.u32.totalorder %s3886_s26, %s4591_s9 }
  0x84   : > { %p3227_p0 = scmp.ne.s32.totalorder %s3886_s26, %s3226_s10  ;;  %p3233_p9 = scmp.lt.u32.totalorder %s3231_s2, %s3226_s10 }
  0x85   : > { %p3235_p11 = scmp.lt.u32.totalorder %s3226_s10, %s3886_s26 }
  0x86   : > { %p3229_p3 = pnand %p3227_p0, %p3847_p13  ;;  %p3234_p10 = por %p3233_p9, %p3232_p5 }
  0x88   : > { %p3230_p4 = pneg %p3229_p3  ;;  %p3236_p8 = por %p3235_p11, %p3234_p10 }
  0x8a   : > { %p3237_p1 = pnand %p3236_p8, %p3230_p4 }
  0x8c   : > { %3240 = shalt.err (!%p3237_p1)
}
  0x8d   : > { %s3241_s6 = scalar_lea.vmem %s3890_s14, 2048  ;;  %s3548_s8 = smov [#allocation12]  }
  0x8e   : > { %p3242_p6 = scmp.ne.s32.totalorder %s3890_s14, %s3241_s6  ;;  %s3246_s15 = sshll.u32 %s3548_s8, 4  ;;  %s3247_s15 = int_to_ptr.vmem [resolvable:$false] %s3246_s15 }
  0x8f   : > { %s3248_s30 = scalar_lea.vmem %s3247_s15, 4096  ;;  %p3249_p0 = scmp.lt.s32.totalorder %s3890_s14, %s3247_s15 }
  0x90   : > { %p3244_p2 = pnand %p3242_p6, %p3847_p13  ;;  %p3250_p3 = scmp.lt.s32.totalorder %s3248_s30, %s3241_s6 }
  0x92   : > { %p3245_p12 = pneg %p3244_p2  ;;  %p3251_p5 = por %p3250_p3, %p3249_p0 }
  0x94   : > { %p3252_p9 = pnand %p3251_p5, %p3245_p12 }
  0x96   : > { %3255 = shalt.err (!%p3252_p9)
}
  0x97   : > { %s3549_s10 = smov 128   ;;  %s3550_s23 = smov 8  }
  0x98   : > { %2937 = dma.hbm_to_vmem [thread:$0]  (!%p3805_p7), %s3886_s26, 2048, %s3890_s14, %s4512_s0, %s3549_s10, %s3549_s10, %s3550_s23  }
  0x99   : > { %s4592_s11 = sld [smem:[#allocation54_spill]]  ;;  %s698_s8 = scalar_lea.vmem [#allocation14], %s2609_s21 }
  0x9a   : > { %s705_s15 = sshll.u32 %s698_s8, 4  ;;  %p4523_p4 = scmp.eq.s32.totalorder %s3713_s20, 0  ;;  %s3925_s15 = int_to_ptr.vmem [resolvable:$true] %s705_s15 }
  0x9b   : > { %p2598_p10 = scmp.ge.s32.totalorder %s3542_s1, 1  ;;  %p518_p11 = scmp.lt.s32.totalorder %s3542_s1, 5 }
  0x9c   : > { %p4593_p8 = scmp.ne.s32.totalorder %s3518_s28, %s3514_s27  ;;  %p4596_p6 = scmp.ne.s32.totalorder %s3506_s25, %s3502_s24 }
  0x9d   : > { %p3948_p12 = pnand %p2598_p10, %p518_p11  ;;  %s2601_s10 = sshll.u32 %s3746_s17, 3 }
  0x9e   : > { %p3935_p1 = por %p4523_p4, %p4593_p8  ;;  %p3944_p2 = por %p4596_p6, %p4523_p4 }
  0x9f   : > { %s3921_s6 = scalar_lea.hbm %s4592_s11, %s2716_s13  ;;  %s3551_s13 = smov [#allocation15]  }
  0xa0   : > { %s4594_s14 = scalar_select %p3935_p1, 1, 0 }
  0xa1   : > { %s4597_s26 = scalar_select %p3944_p2, 1, 0 }
  0xa2   : > { %4595 = sst [smem:[#allocation41_spill]] %s4594_s14  ;;  %s530_s30 = sshll.u32 %s3551_s13, 4  ;;  %s3952_s30 = int_to_ptr.vmem [resolvable:$true] %s530_s30 }
  0xa3   : > { %4598 = sst [smem:[#allocation42_spill]] %s4597_s26  ;;  %p2915_p0 = pneg %p3948_p12 }
  0xa4   : > { %s4599_s21 = scalar_select %p3948_p12, 1, 0 }
  0xa5   : > { %p3959_p3 = pnand %p2915_p0, %p4523_p4  ;;  %s2602_s24 = sshll.u32 %s3538_s19, 7 }
  0xa6   : > { %s551_s2 = scalar_lea.vmem [#allocation3], %s2601_s10  ;;  %s4601_s9 = sld [smem:[#allocation43_spill]] }
  0xa7   : > { %s558_s3 = sshll.u32 %s551_s2, 4  ;;  %s4602_s27 = sld [smem:[#allocation58_spill]]  ;;  %s559_s3 = int_to_ptr.vmem [resolvable:$true] %s558_s3 }
  0xa8   : > { %p3258_p9 = pneg %p3959_p3 }
  0xac   : > { %s3967_s4 = scalar_lea.hbm %s4601_s9, %s2602_s24 }
  0xad   : > { %s4603_s14 = smov %s4602_s27  ;;  %s3256_s1 = scalar_lea.hbm %s4602_s27, 1024 }
  0xae   : > { %p3257_p5 = scmp.ne.s32.totalorder %s4603_s14, %s3256_s1  ;;  %p3263_p8 = scmp.lt.u32.totalorder %s3256_s1, %s4603_s14 }
  0xb0   : > { %p3259_p10 = pnand %p3258_p9, %p3257_p5 }
  0xb2   : > { %p3260_p11 = pneg %p3259_p10 }
  0xb4   : > { %p3265_p6 = pnand %p3263_p8, %p3260_p11 }
  0xb6   : > { %3268 = shalt.err (!%p3265_p6)
}
  0xb7   : > { %s3269_s0 = scalar_lea.vmem %s3952_s30, 1024  ;;  %p3277_p1 = scmp.lt.s32.totalorder %s3952_s30, %s3952_s30 }
  0xb8   : > { %p3270_p0 = scmp.ne.s32.totalorder %s3952_s30, %s3269_s0  ;;  %p3278_p12 = scmp.lt.s32.totalorder %s3269_s0, %s3269_s0 }
  0xba   : > { %p3272_p4 = pnand %p3270_p0, %p3258_p9  ;;  %p3279_p7 = por %p3278_p12, %p3277_p1 }
  0xbc   : > { %p3273_p2 = pneg %p3272_p4 }
  0xbe   : > { %p3280_p13 = pnand %p3279_p7, %p3273_p2 }
  0xc0   : > { %3283 = shalt.err (!%p3280_p13)
}
  0xc1   : > { %s4531_s25 = smov 64   ;;  %s3553_s27 = smov 4  }
  0xc2   : > { %2918 = dma.hbm_to_vmem [thread:$0]  (!%p3959_p3), %s4603_s14, 1024, %s3952_s30, [#allocation16], %s4531_s25, %s4531_s25, %s3553_s27  }
  0xc3   : > { %s548_s1 = scalar_lea.sflag [#allocation4], %s3746_s17  ;;  %s3284_s26 = scalar_lea.hbm %s3967_s4, 128 }
  0xc4   : > { %p3285_p7 = scmp.ne.s32.totalorder %s3967_s4, %s3284_s26  ;;  %p4604_p13 = scmp.ne.s32.totalorder %s4575_s16, 0 }
  0xc5   : > { %s3289_s8 = scalar_lea.hbm %s4601_s9, 256  ;;  %p3290_p2 = scmp.lt.u32.totalorder %s3967_s4, %s4601_s9 }
  0xc6   : > { %p3287_p4 = pnand %p3285_p7, %p4604_p13  ;;  %p3291_p12 = scmp.lt.u32.totalorder %s3289_s8, %s3284_s26 }
  0xc7   : > { %p3293_p9 = scmp.lt.u32.totalorder %s3284_s26, %s3967_s4 }
  0xc8   : > { %p3288_p1 = pneg %p3287_p4  ;;  %p3292_p5 = por %p3291_p12, %p3290_p2 }
  0xca   : > { %p3294_p10 = por %p3293_p9, %p3292_p5 }
  0xcc   : > { %p3295_p3 = pnand %p3294_p10, %p3288_p1 }
  0xce   : > { %3298 = shalt.err (!%p3295_p3)
}
  0xcf   : > { %s3299_s30 = scalar_lea.vmem %s559_s3, 128  ;;  %s3554_s10 = smov [#allocation3]  }
  0xd0   : > { %p3300_p11 = scmp.ne.s32.totalorder %s559_s3, %s3299_s30  ;;  %s3304_s0 = sshll.u32 %s3554_s10, 4  ;;  %s3305_s0 = int_to_ptr.vmem [resolvable:$false] %s3304_s0 }
  0xd1   : > { %s3306_s29 = scalar_lea.vmem %s3305_s0, 256  ;;  %p3307_p0 = scmp.lt.s32.totalorder %s559_s3, %s3305_s0 }
  0xd2   : > { %p3302_p8 = pnand %p3300_p11, %p4604_p13  ;;  %p3308_p7 = scmp.lt.s32.totalorder %s3306_s29, %s3299_s30 }
  0xd4   : > { %p3303_p6 = pneg %p3302_p8  ;;  %p3309_p4 = por %p3308_p7, %p3307_p0 }
  0xd6   : > { %p3310_p2 = pnand %p3309_p4, %p3303_p6 }
  0xd8   : > { %3313 = shalt.err (!%p3310_p2)
}
  0xd9   : > { %s4605_s19 = sld [smem:[#allocation35_spill]]  ;;  %s4607_s26 = sld [smem:[#allocation36_spill]] }
  0xda   : > { %s585_s24 = scalar_lea.vmem [#allocation8], %s3746_s17  ;;  %s2606_s8 = sshll.u32 %s3811_s12, 6 }
  0xdb   : > { %s592_s2 = sshll.u32 %s585_s24, 4  ;;  %s4608_s10 = sld [smem:[#allocation45_spill]]  ;;  %s593_s2 = int_to_ptr.vmem [resolvable:$true] %s592_s2 }
  0xdf   : > { %p4606_p12 = scmp.ne.s32.totalorder %s4605_s19, 0  ;;  %s3314_s13 = scalar_lea.hbm %s4607_s26, 16 }
  0xe0   : > { %p3315_p1 = scmp.ne.s32.totalorder %s4607_s26, %s3314_s13  ;;  %p3323_p8 = scmp.lt.u32.totalorder %s3314_s13, %s4607_s26 }
  0xe1   : > { %2922 = dma.hbm_to_vmem [thread:$0]  (!%p4606_p12), %s3967_s4, 128, %s559_s3, %s548_s1  }
  0xe2   : > { %p3317_p5 = pnand %p3315_p1, %p4604_p13  ;;  %s3319_s0 = scalar_lea.hbm %s4608_s10, 32 }
  0xe3   : > { %p3320_p10 = scmp.lt.u32.totalorder %s4607_s26, %s4608_s10  ;;  %p3321_p3 = scmp.lt.u32.totalorder %s3319_s0, %s3314_s13 }
  0xe4   : > { %p3318_p9 = pneg %p3317_p5 }
  0xe5   : > { %p3322_p11 = por %p3321_p3, %p3320_p10 }
  0xe7   : > { %p3324_p6 = por %p3323_p8, %p3322_p11 }
  0xe9   : > { %p3325_p0 = pnand %p3324_p6, %p3318_p9 }
  0xeb   : > { %3328 = shalt.err (!%p3325_p0)
}
  0xec   : > { %s3329_s17 = scalar_lea.vmem %s593_s2, 16  ;;  %s3555_s4 = smov [#allocation8]  }
  0xed   : > { %p3330_p7 = scmp.ne.s32.totalorder %s593_s2, %s3329_s17  ;;  %s3334_s3 = sshll.u32 %s3555_s4, 4  ;;  %s3335_s3 = int_to_ptr.vmem [resolvable:$false] %s3334_s3 }
  0xee   : > { %s3336_s1 = scalar_lea.vmem %s3335_s3, 32  ;;  %p3337_p1 = scmp.lt.s32.totalorder %s593_s2, %s3335_s3 }
  0xef   : > { %p3332_p4 = pnand %p3330_p7, %p4604_p13  ;;  %p3338_p5 = scmp.lt.s32.totalorder %s3336_s1, %s3329_s17 }
  0xf1   : > { %p3333_p2 = pneg %p3332_p4  ;;  %p3339_p12 = por %p3338_p5, %p3337_p1 }
  0xf3   : > { %p3340_p3 = pnand %p3339_p12, %p3333_p2 }
  0xf5   : > { %3343 = shalt.err (!%p3340_p3)
}
  0xf6   : > { %p4609_p10 = scmp.ne.s32.totalorder %s4605_s19, 0  ;;  %s4610_s25 = scalar_lea.sflag [#allocation7], %s3749_s22 }
  0xf7   : > { %s2715_s16 = sshll.u32 %s3534_s18, 10  ;;  %s631_s24 = scalar_lea.vmem [#allocation11], %s2606_s8 }
  0xf8   : > { %2928 = dma.hbm_to_vmem [thread:$0]  (!%p4609_p10), %s4607_s26, 16, %s593_s2, %s4610_s25  }
  0xf9   : > { %s638_s13 = sshll.u32 %s631_s24, 4  ;;  %s4611_s10 = sld [smem:[#allocation48_spill]]  ;;  %s4040_s13 = int_to_ptr.vmem [resolvable:$true] %s638_s13 }
  0xfa   : > { %p4612_p12 = scmp.ne.s32.totalorder %s4586_s7, 0 }
  0xff   : > { %s4038_s0 = scalar_lea.hbm %s4611_s10, %s2715_s16  ;;  %s3349_s2 = scalar_lea.hbm %s4611_s10, 2048 }
 0x100   : > { %s3344_s19 = scalar_lea.hbm %s4038_s0, 1024  ;;  %p3350_p8 = scmp.lt.u32.totalorder %s4038_s0, %s4611_s10 }
 0x101   : > { %p3345_p13 = scmp.ne.s32.totalorder %s4038_s0, %s3344_s19  ;;  %p3351_p6 = scmp.lt.u32.totalorder %s3349_s2, %s3344_s19 }
 0x102   : > { %p3353_p7 = scmp.lt.u32.totalorder %s3344_s19, %s4038_s0 }
 0x103   : > { %p3347_p9 = pnand %p3345_p13, %p4612_p12  ;;  %p3352_p0 = por %p3351_p6, %p3350_p8 }
 0x105   : > { %p3348_p11 = pneg %p3347_p9  ;;  %p3354_p4 = por %p3353_p7, %p3352_p0 }
 0x107   : > { %p3355_p2 = pnand %p3354_p4, %p3348_p11 }
 0x109   : > { %3358 = shalt.err (!%p3355_p2)
}
 0x10a   : > { %s3359_s17 = scalar_lea.vmem %s4040_s13, 1024  ;;  %s3556_s4 = smov [#allocation11]  }
 0x10b   : > { %p3360_p1 = scmp.ne.s32.totalorder %s4040_s13, %s3359_s17  ;;  %s3364_s3 = sshll.u32 %s3556_s4, 4  ;;  %s3365_s3 = int_to_ptr.vmem [resolvable:$false] %s3364_s3 }
 0x10c   : > { %s3366_s1 = scalar_lea.vmem %s3365_s3, 2048  ;;  %p3367_p10 = scmp.lt.s32.totalorder %s4040_s13, %s3365_s3 }
 0x10d   : > { %p3362_p5 = pnand %p3360_p1, %p4612_p12  ;;  %p3368_p13 = scmp.lt.s32.totalorder %s3366_s1, %s3359_s17 }
 0x10f   : > { %p3363_p3 = pneg %p3362_p5  ;;  %p3369_p9 = por %p3368_p13, %p3367_p10 }
 0x111   : > { %p3370_p8 = pnand %p3369_p9, %p3363_p3 }
 0x113   : > { %3373 = shalt.err (!%p3370_p8)
}
 0x114   : > { %p4613_p11 = scmp.ne.s32.totalorder %s4578_s5, 0  ;;  %s4614_s25 = smov 64  }
 0x115   : > { %s4615_s16 = scalar_lea.sflag [#allocation10], %s3749_s22  ;;  %s3374_s24 = scalar_lea.hbm %s3921_s6, 2048 }
 0x116   : > { %2934 = dma.hbm_to_vmem [thread:$0]  (!%p4613_p11), %s4038_s0, 1024, %s4040_s13, %s4615_s16, %s4614_s25, %s4614_s25, %s3553_s27  }
 0x117   : > { %p3375_p6 = scmp.ne.s32.totalorder %s3921_s6, %s3374_s24  ;;  %s3379_s19 = scalar_lea.hbm %s4592_s11, 4096 }
 0x118   : > { %p3380_p4 = scmp.lt.u32.totalorder %s3921_s6, %s4592_s11  ;;  %p3381_p2 = scmp.lt.u32.totalorder %s3379_s19, %s3374_s24 }
 0x119   : > { %p3377_p0 = pnand %p3375_p6, %p4612_p12  ;;  %p3383_p5 = scmp.lt.u32.totalorder %s3374_s24, %s3921_s6 }
 0x11a   : > { %p3382_p1 = por %p3381_p2, %p3380_p4 }
 0x11b   : > { %p3378_p7 = pneg %p3377_p0 }
 0x11c   : > { %p3384_p3 = por %p3383_p5, %p3382_p1 }
 0x11e   : > { %p3385_p10 = pnand %p3384_p3, %p3378_p7 }
 0x120   : > { %3388 = shalt.err (!%p3385_p10)
}
 0x121   : > { %s3389_s13 = scalar_lea.vmem %s3925_s15, 2048  ;;  %s3557_s0 = smov [#allocation14]  }
 0x122   : > { %p3390_p13 = scmp.ne.s32.totalorder %s3925_s15, %s3389_s13  ;;  %s3394_s2 = sshll.u32 %s3557_s0, 4  ;;  %s3395_s2 = int_to_ptr.vmem [resolvable:$false] %s3394_s2 }
 0x123   : > { %s3396_s8 = scalar_lea.vmem %s3395_s2, 4096  ;;  %p3397_p6 = scmp.lt.s32.totalorder %s3925_s15, %s3395_s2 }
 0x124   : > { %p3392_p9 = pnand %p3390_p13, %p4612_p12  ;;  %p3398_p0 = scmp.lt.s32.totalorder %s3396_s8, %s3389_s13 }
 0x126   : > { %p3393_p8 = pneg %p3392_p9  ;;  %p3399_p4 = por %p3398_p0, %p3397_p6 }
 0x128   : > { %p3400_p2 = pnand %p3399_p4, %p3393_p8 }
 0x12a   : > { %3403 = shalt.err (!%p3400_p2)
}
 0x12b   : > { %s4616_s29 = scalar_lea.sflag [#allocation13], %s3749_s22  ;;  %p4617_p12 = scmp.ne.s32.totalorder %s4599_s21, 0 }
 0x12c   : > { %2940 = dma.hbm_to_vmem [thread:$0]  (!%p4613_p11), %s3921_s6, 2048, %s3925_s15, %s4616_s29, %s4614_s25, %s4614_s25, %s3553_s27  }
 0x12d   : > { %735 = sbr.rel (%p4617_p12) target bundleno = 3594 (0xe0a), region = 88  ;;  %s4618_s7 = sld [smem:[#allocation41_spill]] (!%p4617_p12) }
 0x12e   : > { %s4097_s17 = sand.u32 (!%p4617_p12), 1, %s3518_s28  }
 0x12f   : > { %s2616_s4 = sshll.u32 (!%p4617_p12), %s4097_s17, 3  ;;  %s738_s3 = scalar_lea.sflag (!%p4617_p12), [#allocation4], %s4097_s17 }
 0x130   : > { %s4101_s5 = scalar_lea.vmem (!%p4617_p12), [#allocation3], %s2616_s4 }
 0x133   : > { %p4619_p7 = scmp.ne.s32.totalorder (!%p4617_p12), %s4618_s7, 0 }
 0x135   : > { %3477 = dma.done.wait (%p4619_p7), %s738_s3, 128  }
 0x136   : > { %3479 = vsyncadd (%p4619_p7), %s738_s3, 4294967168  ;;  %s746_s22 = sand.u32 1, %s3713_s20  }
 0x137   : > { %s747_s6 = scalar_lea.sflag [#allocation7], %s746_s22 }
 0x138   : > { %3481 = dma.done.wait (%p4619_p7), %s747_s6, 32  }
 0x139   : > { %3483 = vsyncadd (%p4619_p7), %s747_s6, 4294967264  ;;  %s4620_s21 = sld [smem:[#allocation24_spill]]  ;;  %s4621_s27 = sld [smem:[#allocation42_spill]] }
 0x13a   : > { %s763_s24 = scalar_lea.sflag [#allocation10], %s746_s22 }
 0x13f   : > { %s764_s1 = sand.u32 1, %s4620_s21   ;;  %p4622_p11 = scmp.ne.s32.totalorder %s4621_s27, 0 }
 0x140   : > { %s2893_s25 = smul.u32 192, %s764_s1 }
 0x142   : > { %s4115_s23 = scalar_lea.vmem [#allocation9], %s2893_s25 }
 0x143   : > { %3485 = dma.done.wait (%p4622_p11), %s763_s24, 4096  }
 0x144   : > { %3487 = vsyncadd (%p4622_p11), %s763_s24, 4294963200  ;;  %s2617_s30 = sshll.u32 %s764_s1, 6  ;;  %s2618_s19 = sshll.u32 %s764_s1, 7 }
 0x145   : > { %s4121_s26 = scalar_lea.vmem [#allocation11], %s2617_s30  ;;  %s781_s12 = scalar_lea.sflag [#allocation13], %s746_s22 }
 0x146   : > { %s4123_s13 = scalar_lea.vmem [#allocation12], %s2618_s19 }
 0x147   : > { %3489 = dma.done.wait (%p4622_p11), %s781_s12, 4096  }
 0x148   : > { %3491 = vsyncadd (%p4622_p11), %s781_s12, 4294963200  ;;  %s4129_s0 = scalar_lea.vmem [#allocation14], %s2618_s19  ;;  %p4623_p1 = scmp.eq.s32.totalorder %s3713_s20, 0 }
 0x14a   : > { %3493 = dma.done.wait (%p4623_p1), [#allocation16], 1024   ;;  %p4624_p5 = pmov %p4623_p1 }
 0x14b   : > { %s4625_s2 = sld [smem:[#allocation28_spill]]  ;;  %s4626_s3 = sld [smem:[#allocation49_spill]] }
 0x14c   : > { %3495 = vsyncadd (%p4624_p5), [#allocation16], 4294966272  ;;  %s4629_s16 = sld [smem:[#allocation47_spill]]  ;;  %s4630_s14 = sld [smem:[#allocation53_spill]] }
 0x14d   : > { %s4632_s27 = sld [smem:[#allocation56_spill]]  ;;  %s4633_s30 = sld [smem:[#allocation57_spill]] }
 0x151   : > { %p901_p3 = scmp.lt.s32.totalorder %s4625_s2, 1  ;;  %p2622_p10 = scmp.ne.s32.totalorder %s4625_s2, 0 }
 0x152   : > { %v932_v0 = vld [vmem:[%s4101_s5] sm:$0xff] (!%p2622_p10) }
 0x153   : > { %s4137_s8 = scalar_select %p901_p3, %s4625_s2, 1 }
 0x154   : > { %933 = vst [vmem:[#allocation2] sm:$0xff] (!%p2622_p10), %v932_v0 }
 0x155   : > { %s2894_s29 = smul.u32 3, %s4137_s8  ;;  %s907_s20 = scalar_lea.vmem %s4626_s3, %s4137_s8 }
 0x156   : > { %s2621_s9 = sshll.u32 %s4137_s8, 1  ;;  %s4631_s3 = sld [smem:[#allocation55_spill]] }
 0x157   : > { %s4155_s15 = scalar_lea.vmem %s4629_s16, %s2894_s29  ;;  %s4161_s18 = scalar_lea.vmem %s4630_s14, %s2621_s9 }
 0x158   : > { %s923_s1 = scalar_lea.vmem %s4632_s27, %s4137_s8  ;;  %s926_s19 = scalar_lea.vmem %s4633_s30, %s4137_s8 }
 0x159   : > { %s900_s16 = scalar_lea.vmem [#allocation17], %s4097_s17  ;;  %931 = sbr.rel (%p2622_p10) target bundleno = 352 (0x160), region = 124 }
 0x15c   : > { %s920_s22 = scalar_lea.vmem %s4631_s3, %s4137_s8 }
 0x160 PF: > { %v3052_v1 = vld [vmem:[%s4115_s23 + $0x4] ss:$12 sps:$4 sm:$0xff]   ;;  %v3054_v2 = vld [vmem:[%s4115_s23] ss:$12 sps:$4 sm:$0xff]   ;;  %v3558_v3 = vmov 0   ;;  %v3559_v4 = vmov 0.0   ;;  %v970_v29 = vlaneseq }
 0x161   : > { %1145 = vmatprep.mubr.bf16.mxu0 %v3558_v3  ;;  %2783 = vmatprep.subr.bf16.mxu1 %v3559_v4  ;;  %v3055_v5 = vld [vmem:[%s4115_s23 + $0x1c] ss:$12 sps:$4 sm:$0xff]   ;;  %v3057_v6 = vld [vmem:[%s4115_s23 + $0x18] ss:$12 sps:$4 sm:$0xff]   ;;  %v3058_v7 = vld [vmem:[%s4115_s23 + $0x34] ss:$12 sps:$4 sm:$0xff]  }
 0x162   : > { %1113 = vmatprep.subr.bf16.mxu0 %v3052_v1  ;;  %v3060_v8 = vld [vmem:[%s4115_s23 + $0x30] ss:$12 sps:$4 sm:$0xff]   ;;  %v3061_v9 = vld [vmem:[%s4115_s23 + $0x4c] ss:$12 sps:$4 sm:$0xff]   ;;  %v3063_v10 = vld [vmem:[%s4115_s23 + $0x48] ss:$12 sps:$4 sm:$0xff]  }
 0x163   : > { %1114 = vmatpush1.bf16.msra.mxu0 %v3054_v2  ;;  %v3076_v11 = vld [vmem:[%s4115_s23 + $0x8] ss:$12 sps:$4 sm:$0xff]   ;;  %v3064_v12 = vld [vmem:[%s4115_s23 + $0x64] ss:$12 sps:$4 sm:$0xff]   ;;  %v3077_v13 = vld [vmem:[%s4115_s23 + $0x20] ss:$12 sps:$4 sm:$0xff]  }
 0x164   : > { %1115 = vmatprep.subr.bf16.mxu0 %v3055_v5  ;;  %2784 = vmatpush3.bf16.msra.mxu1 %v3076_v11  ;;  %v3066_v14 = vld [vmem:[%s4115_s23 + $0x60] ss:$12 sps:$4 sm:$0xff]   ;;  %v3067_v15 = vld [vmem:[%s4115_s23 + $0x7c] ss:$12 sps:$4 sm:$0xff]   ;;  %v3069_v16 = vld [vmem:[%s4115_s23 + $0x78] ss:$12 sps:$4 sm:$0xff]  }
 0x165   : > { %2785 = vmatprep.subr.bf16.mxu1 %v3559_v4  ;;  %v3078_v17 = vld [vmem:[%s4115_s23 + $0x38] ss:$12 sps:$4 sm:$0xff]   ;;  %v3070_v18 = vld [vmem:[%s4115_s23 + $0x94] ss:$12 sps:$4 sm:$0xff]   ;;  %v3079_v19 = vld [vmem:[%s4115_s23 + $0x50] ss:$12 sps:$4 sm:$0xff]  }
 0x166   : > { %v3072_v20 = vld [vmem:[%s4115_s23 + $0x90] ss:$12 sps:$4 sm:$0xff]   ;;  %v3073_v21 = vld [vmem:[%s4115_s23 + $0xac] ss:$12 sps:$4 sm:$0xff]   ;;  %v3080_v22 = vld [vmem:[%s4115_s23 + $0x68] ss:$12 sps:$4 sm:$0xff]  }
 0x167   : > { %1116 = vmatpush1.bf16.msra.mxu0 %v3057_v6  ;;  %v3075_v23 = vld [vmem:[%s4115_s23 + $0xa8] ss:$12 sps:$4 sm:$0xff]   ;;  %v3081_v25 = vld [vmem:[%s4115_s23 + $0x80] ss:$12 sps:$4 sm:$0xff]   ;;  %v3082_v27 = vld [vmem:[%s4115_s23 + $0x98] ss:$12 sps:$4 sm:$0xff]  }
 0x168   : > { %1117 = vmatprep.subr.bf16.mxu0 %v3058_v7  ;;  %2786 = vmatpush3.bf16.msra.mxu1 %v3077_v13  ;;  %v4204_v24 = vld [vmem:[#allocation2] sm:$0xff]  ;;  %v3083_v28 = vld [vmem:[%s4115_s23 + $0xb0] ss:$12 sps:$4 sm:$0xff]   ;;  %vm3560_vm0 = vmmov 0   ;;  %v4223_v30 = vshrl.u32 %v970_v29, 7  ;;  %vm1205_vm1 = vcmask 261120  }
 0x169   : > { %2787 = vmatprep.subr.bf16.mxu1 %v3559_v4  ;;  %v935_v26 = vpack.c.bf16 %v4204_v24, %v4204_v24  ;;  %2799 = vmatprep.mubr.msk.bf16.mxu1 %vm3560_vm0, %v3559_v4  ;;  %v968_v32 = vld [vmem:[%s4155_s15] sm:$0x7]  ;;  %s3561_s9 = smov 96   ;;  %s3562_s11 = smov 64   ;;  %vm1268_vm2 = vcmask 1043456   ;;  %vm1252_vm3 = vcmask 64512  }
 0x16a   : > { %v972_v31 = vsub.s32 0, %v4223_v30  ;;  %v976_v33 = vsub.s32 1, %v4223_v30  ;;  %s3563_s14 = smov 32   ;;  %v980_v46 = vsub.s32 2, %v4223_v30  ;;  %s4634_s10 = scalar_lea.vmem [#allocation6], %s4097_s17  ;;  %vm1658_vm4 = vcmask 523264  }
 0x16b   : > { %1118 = vmatpush1.bf16.msra.mxu0 %v3060_v8  ;;  %v4250_v55 = vld [vmem:[%s4634_s10] ss:$0 sm:$0xff]  ;;  %vm1660_vm5 = vcmask 785408   ;;  %s4636_s29 = sld [smem:[#allocation50_spill]]  ;;  %s4638_s30 = sld [smem:[#allocation51_spill]] }
 0x16c   : > { %1119 = vmatprep.subr.bf16.mxu0 %v3061_v9  ;;  %2788 = vmatpush3.bf16.msra.mxu1 %v3078_v17  ;;  %v973_v34 = vrot.slane %v968_v32, %v972_v31  ;;  %v977_v35 = vrot.slane %v968_v32, %v976_v33  ;;  %v981_v47 = vrot.slane %v968_v32, %v980_v46  ;;  %s4643_s24 = sld [smem:[#allocation28_spill]] }
 0x16d   : > { %2789 = vmatprep.subr.bf16.mxu1 %v3559_v4 }
 0x16f   : > { %1120 = vmatpush1.bf16.msra.mxu0 %v3063_v10 }
 0x170   : > { %1121 = vmatprep.subr.bf16.mxu0 %v3064_v12  ;;  %2790 = vmatpush3.bf16.msra.mxu1 %v3079_v19 }
 0x171   : > { %2791 = vmatprep.subr.bf16.mxu1 %v3559_v4  ;;  %s4639_s12 = scalar_lea.vmem %s4638_s30, %s4137_s8 }
 0x172   : > { %p2702_p13 = scmp.ne.s32.totalorder %s4643_s24, 1 }
 0x173   : > { %1122 = vmatpush1.bf16.msra.mxu0 %v3066_v14  ;;  %vm3565_vm6 = vmmov (!%p2702_p13), 0  }
 0x174   : > { %1123 = vmatprep.subr.bf16.mxu0 %v3067_v15  ;;  %2792 = vmatpush3.bf16.msra.mxu1 %v3080_v22 }
 0x175   : > { %2793 = vmatprep.subr.bf16.mxu1 %v3559_v4 }
 0x177   : > { %1124 = vmatpush1.bf16.msra.mxu0 %v3069_v16 }
 0x178   : > { %1125 = vmatprep.subr.bf16.mxu0 %v3070_v18  ;;  %2794 = vmatpush3.bf16.msra.mxu1 %v3081_v25 }
 0x179   : > { %2795 = vmatprep.subr.bf16.mxu1 %v3559_v4 }
 0x17b   : > { %1126 = vmatpush1.bf16.msra.mxu0 %v3072_v20 }
 0x17c   : > { %1127 = vmatprep.subr.bf16.mxu0 %v3073_v21  ;;  %2796 = vmatpush3.bf16.msra.mxu1 %v3082_v27 }
 0x17d   : > { %2797 = vmatprep.subr.bf16.mxu1 %v3559_v4 }
 0x17f   : > { %1128 = vmatpush1.bf16.msra.mxu0 %v3075_v23 }
 0x180   : > { %2827 = vmatprep.subr.bf16.mxu0 %v3559_v4  ;;  %2798 = vmatpush3.bf16.msra.mxu1 %v3083_v28 }
 0x181   : > { %2803 = vmatprep.subr.bf16.mxu1 %v3559_v4 }
 0x182   : > { %1146 = vmatmul.mubr.bf16.vlgmr.msra.gmra.mrb[0].mxu0 %v935_v26 }
 0x183   : > { %2829 = vmatprep.mubr.msk.bf16.mxu0 %vm3560_vm0, %v3559_v4  ;;  %2800 = vmatmul.mubr.bf16.vlgmr.msra.gmra.mrb[0].mxu1 %v935_v26 }
 0x184   : > { %2805 = vmatprep.mubr.msk.bf16.mxu1 %vm3560_vm0, %v3559_v4 }
 0x255   : > { %v1147_v36 = vpop.f32.mrb[0].mxu0 }
 0x256   : > { %v1148_v37 = vadd.f32 %v1147_v36, %v973_v34  ;;  %v1149_v38 = vpop.f32.mrb[1].mxu0  ;;  %v1188_v48 = vpop.f32.mrb[0].mxu1 }
 0x257   : > { %v1150_v39 = vadd.f32 %v1149_v38, %v977_v35  ;;  %v1151_v40 = vpop.f32.mrb[2].mxu0  ;;  %v1189_v49 = vadd.f32 %v1188_v48, %v981_v47  ;;  %v2801_v50 = vpop.f32.mrb[1].mxu1 }
 0x258   : > { %v1152_v41 = vpop.f32.mrb[3].mxu0  ;;  %v1194_v42 = vmul.f32 0.17677669, %v1148_v37  ;;  %v1191_v51 = vpop.f32.mrb[2].mxu1 }
 0x259   : > { %v1197_v43 = vpack.c.bf16 %v1150_v39, %v1150_v39  ;;  %v4243_v52 = vpack.c.bf16 %v1189_v49, %v1189_v49  ;;  %v2802_v53 = vpop.f32.mrb[3].mxu1 }
 0x25a   : > { %v1196_v45 = vpack.c.bf16 %v1194_v42, %v1194_v42 }
 0x25b   : > { %1316 = vrot.lane.b32.xlu1 %v1197_v43, %s3561_s9  ;;  %v1210_v44 = vsel %vm1205_vm1, %v1197_v43, 0  ;;  %v1270_v54 = vsel %vm1268_vm2, %v4243_v52, 0 }
 0x25c   : > { %2804 = vmatpush3.bf16.xpose.msra.mxu1 %v1210_v44 }
 0x25d   : > { %2809 = vmatprep.subr.bf16.mxu1 %v3559_v4 }
 0x25f   : > { %1313 = vrot.lane.b32.xlu1 %v1196_v45, %s3561_s9 }
 0x263   : > { %1425 = vrot.lane.b32.xlu1 %v1196_v45, %s3562_s11  ;;  %2806 = vmatmul.mubr.msk.bf16.vlgmr.msra.gmra.mrb[4].mxu1 %vm1205_vm1, %v1196_v45 }
 0x264   : > { %2811 = vmatprep.mubr.msk.bf16.mxu1 %vm3560_vm0, %v3559_v4  ;;  %2810 = vmatpush3.bf16.msra.mxu1 %v1270_v54 }
 0x265   : > { %2815 = vmatprep.subr.bf16.mxu1 %v3559_v4 }
 0x267   : > { %1537 = vrot.lane.b32.xlu1 %v1197_v43, %s3563_s14 }
 0x26b   : > { %1535 = vrot.lane.b32.xlu1 %v1196_v45, %s3563_s14 }
 0x2cd   : > { %v1317_v5 = vpop.permute.xlu1 %1316 }
 0x2ce   : > { %v1322_v16 = vsel %vm1205_vm1, %v1317_v5, 0 }
 0x2d1   : > { %v1314_v6 = vpop.permute.xlu1 %1313 }
 0x2d5   : > { %v1426_v8 = vpop.permute.xlu1 %1425 }
 0x2d9   : > { %v1538_v11 = vpop.permute.xlu1 %1537 }
 0x2da   : > { %v1543_v14 = vsel %vm1205_vm1, %v1538_v11, 0 }
 0x2dd   : > { %v1536_v17 = vpop.permute.xlu1 %1535 }
 0x336   : > { %v1246_v56 = vpop.f32.mrb[4].mxu1 }
 0x337   : > { %v1247_v57 = vadd.f32 %v4250_v55, %v1246_v56  ;;  %v2807_v58 = vpop.f32.mrb[5].mxu1 }
 0x338   : > { %v1249_v59 = vpop.f32.mrb[6].mxu1 }
 0x339   : > { %v2808_v60 = vpop.f32.mrb[7].mxu1  ;;  %v1253_v61 = vsel %vm1252_vm3, %v1247_v57, -inf }
 0x33a   : > { %1254 = vmax.xlane.f32.xlu0 %v1253_v61 }
 0x3c7   : > { %v1255_v62 = vpop.xlane.xlu0 %1254 }
 0x3c8   : > { %v1256_v63 = vsub.f32 %v1247_v57, %v1255_v62 }
 0x3ca   : > { %v1257_v0 = vmul.f32 1.442695, %v1256_v63 }
 0x3cc   : > { %3132 = vpow2.f32 %v1257_v0 }
 0x3d6   : > { %v3133_v1 = vpop.eup %3132 }
 0x3d7   : > { %v1259_v2 = vsel %vm1252_vm3, %v3133_v1, 0.0 }
 0x3d8   : > { %1260 = vadd.xlane.f32.xlu0 %v1259_v2 }
 0x3ee   : > { %1427 = vrot.lane.b32.xlu0 %v1197_v43, %s3562_s11 }
 0x465   : > { %v1261_v7 = vpop.xlane.xlu0 %1260 }
 0x466   : > { %3134 = vrcp.f32 %v1261_v7 }
 0x469   : > { %v1428_v9 = vpop.permute.xlu0 %1427 }
 0x46a   : > { %v1433_v10 = vsel %vm1205_vm1, %v1428_v9, 0 }
 0x46b   : > { %2828 = vmatpush3.bf16.xpose.msra.mxu0 %v1433_v10 }
 0x46c   : > { %2839 = vmatprep.subr.bf16.mxu0 %v3559_v4 }
 0x470   : > { %v3135_v12 = vpop.eup %3134 }
 0x471   : > { %v1263_v13 = vmul.f32 %v3135_v12, %v3133_v1 }
 0x472   : > { %2830 = vmatmul.mubr.msk.bf16.vlgmr.msra.gmra.mrb[4].mxu0 %vm1205_vm1, %v1426_v8 }
 0x473   : > { %2840 = vmatpush3.bf16.xpose.msra.mxu0 %v1543_v14  ;;  %v1264_v15 = vpack.c.bf16 %v1263_v13, %v1263_v13  ;;  %2841 = vmatprep.mubr.msk.bf16.mxu0 %vm3560_vm0, %v3559_v4 }
 0x474   : > { %2851 = vmatprep.subr.bf16.mxu0 %v3559_v4 }
 0x475   : > { %2812 = vmatmul.mubr.msk.bf16.vlgmr.msra.gmra.mrb[8].mxu1 %vm1252_vm3, %v1264_v15  ;;  %v3084_v15 = vld [vmem:[%s4121_s26] sm:$0xff]  }
 0x476   : > { %2816 = vmatpush3.bf16.xpose.msra.mxu1 %v1322_v16  ;;  %2817 = vmatprep.mubr.msk.bf16.mxu1 %vm3560_vm0, %v3559_v4  ;;  %v3085_v16 = vld [vmem:[%s4121_s26 + $0x8] sm:$0xff]  }
 0x477   : > { %2821 = vmatprep.subr.bf16.mxu1 %v3559_v4 }
 0x47a   : > { %2842 = vmatmul.mubr.msk.bf16.vlgmr.msra.gmra.mrb[8].mxu0 %vm1205_vm1, %v1536_v17  ;;  %v3086_v17 = vld [vmem:[%s4121_s26 + $0x10] sm:$0xff]  }
 0x47b   : > { %2867 = vmatprep.mubr.msk.bf16.mxu0 %vm3560_vm0, %v3559_v4  ;;  %2852 = vmatpush3.bf16.msra.mxu0 %v3084_v15 }
 0x47c   : > { %2853 = vmatprep.subr.bf16.mxu0 %v3559_v4 }
 0x47d   : > { %2818 = vmatmul.mubr.msk.bf16.vlgmr.msra.gmra.mrb[12].mxu1 %vm1205_vm1, %v1314_v6 }
 0x47e   : > { %2823 = vmatprep.mubr.msk.bf16.mxu1 %vm3560_vm0, %v3559_v4 }
 0x47f   : > { %2854 = vmatpush3.bf16.msra.mxu0 %v3085_v16 }
 0x480   : > { %2855 = vmatprep.subr.bf16.mxu0 %v3559_v4 }
 0x483   : > { %2856 = vmatpush3.bf16.msra.mxu0 %v3086_v17 }
 0x484   : > { %2857 = vmatprep.subr.bf16.mxu0 %v3559_v4 }
 0x545   : > { %v1469_v18 = vpop.f32.mrb[4].mxu0 }
 0x546   : > { %v1470_v19 = vadd.f32 %v4250_v55, %v1469_v18  ;;  %v2831_v20 = vpop.f32.mrb[5].mxu0  ;;  %v3087_v18 = vld [vmem:[%s4121_s26 + $0x18] sm:$0xff]  }
 0x547   : > { %v1472_v21 = vpop.f32.mrb[6].mxu0  ;;  %2858 = vmatpush3.bf16.msra.mxu0 %v3087_v18  ;;  %v3090_v20 = vld [vmem:[%s4121_s26 + $0x30] sm:$0xff]   ;;  %v3116_v18 = vld [vmem:[%s4129_s0 + $0x40] sm:$0xff]  }
 0x548   : > { %v4275_v22 = vpop.f32.mrb[8].mxu1  ;;  %v2832_v23 = vpop.f32.mrb[7].mxu0  ;;  %v1475_v25 = vsel %vm1252_vm3, %v1470_v19, -inf  ;;  %2859 = vmatprep.subr.bf16.mxu0 %v3559_v4 }
 0x549   : > { %1476 = vmax.xlane.f32.xlu0 %v1475_v25  ;;  %v2813_v26 = vpop.f32.mrb[9].mxu1 }
 0x54a   : > { %v1309_v27 = vpop.f32.mrb[10].mxu1 }
 0x54b   : > { %v2814_v28 = vpop.f32.mrb[11].mxu1  ;;  %v3091_v27 = vld [vmem:[%s4121_s26 + $0x38] sm:$0xff]  }
 0x54d   : > { %v1579_v29 = vpop.f32.mrb[8].mxu0 }
 0x54e   : > { %v2843_v32 = vpop.f32.mrb[9].mxu0  ;;  %v1580_v40 = vadd.f32 %v4250_v55, %v1579_v29 }
 0x54f   : > { %v1582_v34 = vpop.f32.mrb[10].mxu0 }
 0x550   : > { %v1358_v35 = vpop.f32.mrb[12].mxu1  ;;  %v2844_v36 = vpop.f32.mrb[11].mxu0  ;;  %v1585_v43 = vsel %vm1252_vm3, %v1580_v40, -inf }
 0x551   : > { %v1359_v37 = vadd.f32 %v4250_v55, %v1358_v35  ;;  %v2819_v38 = vpop.f32.mrb[13].mxu1 }
 0x552   : > { %v1361_v39 = vpop.f32.mrb[14].mxu1 }
 0x553   : > { %v2820_v41 = vpop.f32.mrb[15].mxu1  ;;  %v1364_v42 = vsel %vm1252_vm3, %v1359_v37, -inf }
 0x554   : > { %1365 = vmax.xlane.f32.xlu1 %v1364_v42 }
 0x558   : > { %1586 = vmax.xlane.f32.xlu1 %v1585_v43 }
 0x5d6   : > { %v1477_v44 = vpop.xlane.xlu0 %1476 }
 0x5d7   : > { %v1478_v45 = vsub.f32 %v1470_v19, %v1477_v44  ;;  %v3088_v19 = vld [vmem:[%s4121_s26 + $0x20] sm:$0xff]  }
 0x5d8   : > { %2860 = vmatpush3.bf16.msra.mxu0 %v3088_v19  ;;  %v3117_v19 = vld [vmem:[%s4129_s0] sm:$0xff]  }
 0x5d9   : > { %v1479_v46 = vmul.f32 1.442695, %v1478_v45  ;;  %2861 = vmatprep.subr.bf16.mxu0 %v3559_v4  ;;  %v2656_v45 = vld [vmem:[%s907_s20] ss:$0 sm:$0xff]  ;;  %s4637_s20 = scalar_lea.vmem %s4636_s29, %s4137_s8 }
 0x5db   : > { %3136 = vpow2.f32 %v1479_v46 }
 0x5e1   : > { %v1366_v47 = vpop.xlane.xlu1 %1365 }
 0x5e2   : > { %v1367_v48 = vsub.f32 %v1359_v37, %v1366_v47 }
 0x5e4   : > { %v1368_v54 = vmul.f32 1.442695, %v1367_v48 }
 0x5e5   : > { %v3137_v49 = vpop.eup %3136  ;;  %v1587_v50 = vpop.xlane.xlu1 %1586 }
 0x5e6   : > { %v1588_v51 = vsub.f32 %v1580_v40, %v1587_v50  ;;  %v1481_v53 = vsel %vm1252_vm3, %v3137_v49, 0.0 }
 0x5e7   : > { %1482 = vadd.xlane.f32.xlu0 %v1481_v53  ;;  %v3094_v53 = vld [vmem:[%s4123_s13 + $0x4] ss:$8 sps:$4 sm:$0xff]  }
 0x5e8   : > { %v1589_v55 = vmul.f32 1.442695, %v1588_v51  ;;  %v3092_v51 = vld [vmem:[%s4123_s13] ss:$8 sps:$4 sm:$0xff]  }
 0x5ea   : > { %3138 = vpow2.f32 %v1589_v55  ;;  %v3095_v55 = vld [vmem:[%s4123_s13 + $0x10] ss:$8 sps:$4 sm:$0xff]  }
 0x5eb   : > { %3140 = vpow2.f32 %v1368_v54  ;;  %v3097_v54 = vld [vmem:[%s4123_s13 + $0x14] ss:$8 sps:$4 sm:$0xff]  }
 0x5f4   : > { %v3139_v56 = vpop.eup %3138 }
 0x5f5   : > { %v1591_v57 = vsel %vm1252_vm3, %v3139_v56, 0.0  ;;  %v3141_v58 = vpop.eup %3140 }
 0x5f6   : > { %1592 = vadd.xlane.f32.xlu1 %v1591_v57  ;;  %v1370_v59 = vsel %vm1252_vm3, %v3141_v58, 0.0  ;;  %v3098_v57 = vld [vmem:[%s4123_s13 + $0x20] ss:$8 sps:$4 sm:$0xff]  }
 0x5fa   : > { %1371 = vadd.xlane.f32.xlu1 %v1370_v59 }
 0x5fd   : > { %1377 = vrot.lane.b32.xlu0 %v4243_v52, %s3561_s9 }
 0x60b   : > { %1487 = vrot.lane.b32.xlu1 %v4243_v52, %s3562_s11 }
 0x60f   : > { %1597 = vrot.lane.b32.xlu1 %v4243_v52, %s3563_s14 }
 0x674   : > { %v1483_v60 = vpop.xlane.xlu0 %1482 }
 0x678   : > { %v1378_v61 = vpop.permute.xlu0 %1377 }
 0x679   : > { %v1383_v62 = vsel %vm1268_vm2, %v1378_v61, 0  ;;  %v3103_v61 = vld [vmem:[%s4123_s13 + $0x34] ss:$8 sps:$4 sm:$0xff]  }
 0x67a   : > { %2822 = vmatpush3.bf16.msra.mxu1 %v1383_v62  ;;  %v3101_v62 = vld [vmem:[%s4123_s13 + $0x30] ss:$8 sps:$4 sm:$0xff]  }
 0x67b   : > { %2833 = vmatprep.subr.bf16.mxu1 %v3559_v4 }
 0x683   : > { %v1593_v63 = vpop.xlane.xlu1 %1592 }
 0x687   : > { %v1372_v0 = vpop.xlane.xlu1 %1371 }
 0x688   : > { %3142 = vrcp.f32 %v1372_v0  ;;  %v3104_v0 = vld [vmem:[%s4123_s13 + $0x40] ss:$8 sps:$4 sm:$0xff]  }
 0x689   : > { %3144 = vrcp.f32 %v1483_v60 }
 0x68a   : > { %3146 = vrcp.f32 %v1593_v63  ;;  %v3106_v63 = vld [vmem:[%s4123_s13 + $0x44] ss:$8 sps:$4 sm:$0xff]  }
 0x68b   : > { %v1488_v5 = vpop.permute.xlu1 %1487 }
 0x68c   : > { %v1493_v8 = vsel %vm1268_vm2, %v1488_v5, 0  ;;  %v3112_v5 = vld [vmem:[%s4123_s13 + $0x64] ss:$8 sps:$4 sm:$0xff]  }
 0x68f   : > { %v1598_v9 = vpop.permute.xlu1 %1597 }
 0x690   : > { %v1603_v12 = vsel %vm1268_vm2, %v1598_v9, 0 }
 0x692   : > { %v3143_v1 = vpop.eup %3142 }
 0x693   : > { %v1374_v2 = vmul.f32 %v3143_v1, %v3141_v58  ;;  %v3145_v7 = vpop.eup %3144  ;;  %v3109_v1 = vld [vmem:[%s4123_s13 + $0x54] ss:$8 sps:$4 sm:$0xff]  }
 0x694   : > { %v1485_v52 = vmul.f32 %v3145_v7, %v3137_v49  ;;  %v3147_v11 = vpop.eup %3146  ;;  %v3115_v7 = vld [vmem:[%s4123_s13 + $0x74] ss:$8 sps:$4 sm:$0xff]  }
 0x695   : > { %v1375_v6 = vpack.c.bf16 %v1374_v2, %v1374_v2  ;;  %v1595_v13 = vmul.f32 %v3147_v11, %v3139_v56  ;;  %v3100_v56 = vld [vmem:[%s4123_s13 + $0x24] ss:$8 sps:$4 sm:$0xff]   ;;  %v3107_v2 = vld [vmem:[%s4123_s13 + $0x50] ss:$8 sps:$4 sm:$0xff]  }
 0x696   : > { %v1486_v10 = vpack.c.bf16 %v1485_v52, %v1485_v52 }
 0x697   : > { %2824 = vmatmul.mubr.msk.bf16.vlgmr.msra.gmra.mrb[16].mxu1 %vm1252_vm3, %v1375_v6  ;;  %v1596_v14 = vpack.c.bf16 %v1595_v13, %v1595_v13  ;;  %v3110_v6 = vld [vmem:[%s4123_s13 + $0x60] ss:$8 sps:$4 sm:$0xff]  }
 0x698   : > { %2834 = vmatpush3.bf16.msra.mxu1 %v1493_v8  ;;  %2835 = vmatprep.mubr.msk.bf16.mxu1 %vm3560_vm0, %v3559_v4  ;;  %v3113_v8 = vld [vmem:[%s4123_s13 + $0x70] ss:$8 sps:$4 sm:$0xff]  }
 0x699   : > { %2845 = vmatprep.subr.bf16.mxu1 %v3559_v4 }
 0x69f   : > { %2836 = vmatmul.mubr.msk.bf16.vlgmr.msra.gmra.mrb[20].mxu1 %vm1252_vm3, %v1486_v10 }
 0x6a0   : > { %2846 = vmatpush3.bf16.msra.mxu1 %v1603_v12  ;;  %2847 = vmatprep.mubr.msk.bf16.mxu1 %vm3560_vm0, %v3559_v4  ;;  %v2665_v12 = vld [vmem:[%s4637_s20] ss:$0 sm:$0xff] }
 0x6a1   : > { %1912 = vmatprep.subr.bf16.mxu1 %v3094_v53 }
 0x6a7   : > { %2848 = vmatmul.mubr.msk.bf16.vlgmr.msra.gmra.mrb[24].mxu1 %vm1252_vm3, %v1596_v14  ;;  %v2666_v14 = vld [vmem:[%s4639_s12] ss:$0 sm:$0xff] }
 0x6a8   : > { %1944 = vmatprep.mubr.bf16.mxu1 %v3558_v3  ;;  %v3089_v3 = vld [vmem:[%s4121_s26 + $0x28] sm:$0xff]   ;;  %1913 = vmatpush1.bf16.msra.mxu1 %v3092_v51 }
 0x6a9   : > { %2862 = vmatpush3.bf16.msra.mxu0 %v3089_v3  ;;  %1914 = vmatprep.subr.bf16.mxu1 %v3097_v54  ;;  %v3118_v3 = vld [vmem:[%s4129_s0 + $0x48] sm:$0xff]  }
 0x6aa   : > { %2863 = vmatprep.subr.bf16.mxu0 %v3559_v4 }
 0x6ac   : > { %1915 = vmatpush1.bf16.msra.mxu1 %v3095_v55 }
 0x6ad   : > { %2864 = vmatpush3.bf16.msra.mxu0 %v3090_v20  ;;  %1916 = vmatprep.subr.bf16.mxu1 %v3100_v56  ;;  %v3119_v20 = vld [vmem:[%s4129_s0 + $0x8] sm:$0xff]  }
 0x6ae   : > { %2865 = vmatprep.subr.bf16.mxu0 %v3559_v4 }
 0x6b0   : > { %1917 = vmatpush1.bf16.msra.mxu1 %v3098_v57 }
 0x6b1   : > { %2866 = vmatpush3.bf16.msra.mxu0 %v3091_v27  ;;  %1918 = vmatprep.subr.bf16.mxu1 %v3103_v61  ;;  %v3124_v27 = vld [vmem:[%s4129_s0 + $0x60] sm:$0xff]  }
 0x6b2   : > { %2752 = vmatprep.subr.bf16.mxu0 %v3116_v18 }
 0x6b4   : > { %1919 = vmatpush1.bf16.msra.mxu1 %v3101_v62 }
 0x6b5   : > { %1920 = vmatprep.subr.bf16.mxu1 %v3106_v63  ;;  %v2683_v63 = vld [vmem:[%s920_s22] ss:$0 sm:$0xff] }
 0x6b8   : > { %1921 = vmatpush1.bf16.msra.mxu1 %v3104_v0 }
 0x6b9   : > { %1922 = vmatprep.subr.bf16.mxu1 %v3109_v1 }
 0x6bc   : > { %1923 = vmatpush1.bf16.msra.mxu1 %v3107_v2 }
 0x6bd   : > { %1924 = vmatprep.subr.bf16.mxu1 %v3112_v5 }
 0x6c0   : > { %1925 = vmatpush1.bf16.msra.mxu1 %v3110_v6 }
 0x6c1   : > { %1926 = vmatprep.subr.bf16.mxu1 %v3115_v7 }
 0x6c4   : > { %1927 = vmatpush1.bf16.msra.mxu1 %v3113_v8 }
 0x76a   : > { %v1419_v21 = vpop.f32.mrb[16].mxu1 }
 0x76b   : > { %1646 = vrot.lane.b32.xlu0 %v1419_v21, %s3563_s14  ;;  %v2825_v23 = vpop.f32.mrb[17].mxu1  ;;  %v3120_v21 = vld [vmem:[%s4129_s0 + $0x50] sm:$0xff]  }
 0x76c   : > { %v1422_v25 = vpop.f32.mrb[18].mxu1  ;;  %v3121_v23 = vld [vmem:[%s4129_s0 + $0x10] sm:$0xff]  }
 0x76d   : > { %v2826_v26 = vpop.f32.mrb[19].mxu1  ;;  %v3122_v25 = vld [vmem:[%s4129_s0 + $0x58] sm:$0xff]  }
 0x76e   : > { %v3123_v26 = vld [vmem:[%s4129_s0 + $0x18] sm:$0xff]  }
 0x772   : > { %v1529_v28 = vpop.f32.mrb[20].mxu1 }
 0x773   : > { %1650 = vrot.lane.b32.xlu1 %v1529_v28, %s3562_s11  ;;  %v2837_v29 = vpop.f32.mrb[21].mxu1  ;;  %v3125_v28 = vld [vmem:[%s4129_s0 + $0x20] sm:$0xff]  }
 0x774   : > { %v1532_v32 = vpop.f32.mrb[22].mxu1  ;;  %v3126_v29 = vld [vmem:[%s4129_s0 + $0x68] sm:$0xff]  }
 0x775   : > { %v2838_v34 = vpop.f32.mrb[23].mxu1  ;;  %v3127_v32 = vld [vmem:[%s4129_s0 + $0x28] sm:$0xff]  }
 0x776   : > { %v3128_v34 = vld [vmem:[%s4129_s0 + $0x70] sm:$0xff]  }
 0x77a   : > { %v1639_v35 = vpop.f32.mrb[24].mxu1 }
 0x77b   : > { %1654 = vrot.lane.b32.xlu0 %v1639_v35, %s3561_s9  ;;  %v2849_v36 = vpop.f32.mrb[25].mxu1  ;;  %v3129_v35 = vld [vmem:[%s4129_s0 + $0x30] sm:$0xff]   ;;  %s4645_s9 = scalar_lea.vmem (!%p2702_p13), [#allocation8], %s4097_s17 }
 0x77c   : > { %v1642_v37 = vpop.f32.mrb[26].mxu1  ;;  %v3130_v36 = vld [vmem:[%s4129_s0 + $0x78] sm:$0xff]  }
 0x77d   : > { %v2850_v38 = vpop.f32.mrb[27].mxu1  ;;  %v3131_v37 = vld [vmem:[%s4129_s0 + $0x38] sm:$0xff]  }
 0x77e   : > { %v1820_v38 = vld [vmem:[%s4161_s18] sm:$0x3] }
 0x7dd   : > { %v1647_v39 = vpop.permute.xlu0 %1646 }
 0x7de   : > { %v1657_v4 = vsel %vm1205_vm1, %v4275_v22, %v1647_v39  ;;  %v1825_v39 = vrot.slane %v1820_v38, %v972_v31 }
 0x7e5   : > { %v1651_v40 = vpop.permute.xlu1 %1650 }
 0x7e6   : > { %v1659_v41 = vsel %vm1658_vm4, %v1657_v4, %v1651_v40  ;;  %v1829_v40 = vrot.slane %v1820_v38, %v976_v33 }
 0x7ed   : > { %v1655_v42 = vpop.permute.xlu0 %1654 }
 0x7ee   : > { %v1661_v43 = vsel %vm1660_vm5, %v1659_v41, %v1655_v42 }
 0x7ef   : > { %v1662_v44 = vpack.c.bf16 %v1661_v43, %v1661_v43 }
 0x7f1   : > { %2868 = vmatmul.mubr.bf16.vlgmr.msra.gmra.mrb[12].mxu0 %v1662_v44 }
 0x7f2   : > { %2753 = vmatpush3.bf16.msra.mxu0 %v3117_v19 }
 0x7f3   : > { %2754 = vmatprep.subr.bf16.mxu0 %v3118_v3  ;;  %v3156_v3 = vld [vmem:[#allocation15] sm:$0xff] (!%p2702_p13)  }
 0x7f6   : > { %2755 = vmatpush3.bf16.msra.mxu0 %v3119_v20  ;;  %v3564_v20 = vmov (!%p2702_p13), 0.0  }
 0x7f7   : > { %2756 = vmatprep.subr.bf16.mxu0 %v3120_v21  ;;  %v3157_v21 = vld [vmem:[#allocation15 + $0x8] sm:$0xff] (!%p2702_p13)  }
 0x7fa   : > { %2757 = vmatpush3.bf16.msra.mxu0 %v3121_v23  ;;  %v3158_v23 = vld [vmem:[#allocation15 + $0x10] sm:$0xff] (!%p2702_p13)  }
 0x7fb   : > { %2758 = vmatprep.subr.bf16.mxu0 %v3122_v25  ;;  %v3159_v25 = vld [vmem:[#allocation15 + $0x18] sm:$0xff] (!%p2702_p13)  }
 0x7fe   : > { %2759 = vmatpush3.bf16.msra.mxu0 %v3123_v26  ;;  %v3160_v26 = vld [vmem:[#allocation15 + $0x20] sm:$0xff] (!%p2702_p13)  }
 0x7ff   : > { %2760 = vmatprep.subr.bf16.mxu0 %v3124_v27  ;;  %v3161_v27 = vld [vmem:[#allocation15 + $0x28] sm:$0xff] (!%p2702_p13)  }
 0x802   : > { %2761 = vmatpush3.bf16.msra.mxu0 %v3125_v28  ;;  %v3162_v28 = vld [vmem:[#allocation15 + $0x30] sm:$0xff] (!%p2702_p13)  }
 0x803   : > { %2762 = vmatprep.subr.bf16.mxu0 %v3126_v29  ;;  %v3163_v29 = vld [vmem:[#allocation15 + $0x38] sm:$0xff] (!%p2702_p13)  }
 0x806   : > { %2763 = vmatpush3.bf16.msra.mxu0 %v3127_v32 }
 0x807   : > { %2764 = vmatprep.subr.bf16.mxu0 %v3128_v34 }
 0x80a   : > { %2765 = vmatpush3.bf16.msra.mxu0 %v3129_v35 }
 0x80b   : > { %2766 = vmatprep.subr.bf16.mxu0 %v3130_v36 }
 0x80e   : > { %2767 = vmatpush3.bf16.msra.mxu0 %v3131_v37 }
 0x80f   : > { %2871 = vmatprep.subr.bf16.mxu0 (!%p2702_p13), %v3564_v20 }
 0x8c4   : > { %v1768_v46 = vpop.f32.mrb[12].mxu0 }
 0x8c5   : > { %v1769_v47 = vadd.f32 %v2656_v45, %v1768_v46  ;;  %v2869_v48 = vpop.f32.mrb[13].mxu0 }
 0x8c6   : > { %v1771_v49 = vpop.f32.mrb[14].mxu0 }
 0x8c7   : > { %v2870_v50 = vpop.f32.mrb[15].mxu0  ;;  %v1774_v22 = vadd.f32 %v1769_v47, %v4204_v24 }
 0x8c9   : > { %1777 = vadd.xlane.f32.xlu1 %v1774_v22 }
 0x956   : > { %v1778_v24 = vpop.xlane.xlu1 %1777 }
 0x957   : > { %v1780_v58 = vmul.f32 0.0078125, %v1778_v24 }
 0x959   : > { %v1781_v59 = vsub.f32 %v1774_v22, %v1780_v58 }
 0x95b   : > { %v1782_v60 = vmul.f32 %v1781_v59, %v1781_v59 }
 0x95d   : > { %1783 = vadd.xlane.f32.xlu0 %v1782_v60 }
 0x9ea   : > { %v1784_v52 = vpop.xlane.xlu0 %1783 }
 0x9eb   : > { %v1785_v9 = vmul.f32 0.0078125, %v1784_v52 }
 0x9ed   : > { %v1786_v10 = vadd.f32 1e-12, %v1785_v9 }
 0x9ef   : > { %3148 = vrsqrt.f32 %v1786_v10 }
 0x9f9   : > { %v3149_v11 = vpop.eup %3148 }
 0x9fa   : > { %v1788_v13 = vmul.f32 %v3149_v11, %v1781_v59 }
 0x9fc   : > { %v1795_v15 = vmul.f32 %v2665_v12, %v1788_v13 }
 0x9fe   : > { %v4356_v16 = vadd.f32 %v2666_v14, %v1795_v15  ;;  %v2700_v15 = vld [vmem:[%s923_s1] ss:$0 sm:$0xff] }
 0xa00   : > { %v1803_v17 = vpack.c.bf16 %v4356_v16, %v4356_v16 }
 0xa02   : > { %1945 = vmatmul.mubr.bf16.vlgmr.msra.gmra.mrb[28].mxu1 %v1803_v17 }
 0xad5   : > { %v1946_v4 = vpop.f32.mrb[28].mxu1 }
 0xad6   : > { %v1947_v41 = vadd.f32 %v1946_v4, %v1825_v39  ;;  %v1948_v42 = vpop.f32.mrb[29].mxu1 }
 0xad7   : > { %v1949_v43 = vadd.f32 %v1948_v42, %v1829_v40  ;;  %v1950_v44 = vpop.f32.mrb[30].mxu1  ;;  %v2288_v40 = vld [vmem:[%s4645_s9] sm:$0x1] (!%p2702_p13) }
 0xad8   : > { %v1955_v45 = vmul.f32 0.044715, %v1947_v41  ;;  %v1951_v46 = vpop.f32.mrb[31].mxu1  ;;  %v1953_v33 = vmul.f32 0.5, %v1947_v41  ;;  %vm2289_vm7 = vcmp.ge.f32.partialorder (!%p2702_p13), %v2288_v40, 0.1 }
 0xad9   : > { %v1956_v47 = vmul.f32 0.044715, %v1949_v43  ;;  %v1954_v57 = vmul.f32 0.5, %v1949_v43  ;;  %v2711_v4 = vsel (!%p2702_p13), %vm2289_vm7, 1.0, %v3564_v20 }
 0xada   : > { %v1957_v48 = vmul.f32 %v1955_v45, %v1947_v41 }
 0xadb   : > { %v1958_v49 = vmul.f32 %v1956_v47, %v1949_v43 }
 0xadc   : > { %v1959_v50 = vmul.f32 %v1957_v48, %v1947_v41 }
 0xadd   : > { %v1960_v22 = vmul.f32 %v1958_v49, %v1949_v43 }
 0xade   : > { %v1961_v51 = vadd.f32 %v1959_v50, %v1947_v41 }
 0xadf   : > { %v1962_v53 = vadd.f32 %v1960_v22, %v1949_v43 }
 0xae0   : > { %v1963_v54 = vmul.f32 0.7978846, %v1961_v51 }
 0xae1   : > { %v1964_v55 = vmul.f32 0.7978846, %v1962_v53 }
 0xae2   : > { %3150 = vtanh.f32 %v1963_v54 }
 0xae3   : > { %3152 = vtanh.f32 %v1964_v55 }
 0xaec   : > { %v3151_v30 = vpop.eup %3150 }
 0xaed   : > { %v3153_v31 = vpop.eup %3152  ;;  %v1967_v56 = vadd.f32 1.0, %v3151_v30 }
 0xaee   : > { %v1968_v24 = vadd.f32 1.0, %v3153_v31 }
 0xaef   : > { %v1969_v58 = vmul.f32 %v1967_v56, %v1953_v33 }
 0xaf0   : > { %v1970_v59 = vmul.f32 %v1968_v24, %v1954_v57 }
 0xaf1   : > { %v1971_v61 = vpack.c.bf16 %v1969_v58, %v1969_v58 }
 0xaf2   : > { %v1972_v60 = vpack.c.bf16 %v1970_v59, %v1970_v59 }
 0xaf4   : > { %2140 = vmatprep.mubr.bf16.mxu0 %v1972_v60 }
 0xaf5   : > { %2141 = vmatmul.mubr.bf16.vlgmr.msra.gmra.mrb[16].mxu0 %v1971_v61 }
 0xaf6   : > { %2872 = vmatpush3.bf16.msra.mxu0 (!%p2702_p13), %v3156_v3  ;;  %2887 = vmatprep.mubr.msk.bf16.mxu0 (!%p2702_p13), %vm3565_vm6, %v3564_v20 }
 0xaf7   : > { %2873 = vmatprep.subr.bf16.mxu0 (!%p2702_p13), %v3564_v20 }
 0xafa   : > { %2874 = vmatpush3.bf16.msra.mxu0 (!%p2702_p13), %v3157_v21 }
 0xafb   : > { %2875 = vmatprep.subr.bf16.mxu0 (!%p2702_p13), %v3564_v20 }
 0xafe   : > { %2876 = vmatpush3.bf16.msra.mxu0 (!%p2702_p13), %v3158_v23 }
 0xaff   : > { %2877 = vmatprep.subr.bf16.mxu0 (!%p2702_p13), %v3564_v20 }
 0xb02   : > { %2878 = vmatpush3.bf16.msra.mxu0 (!%p2702_p13), %v3159_v25 }
 0xb03   : > { %2879 = vmatprep.subr.bf16.mxu0 (!%p2702_p13), %v3564_v20 }
 0xb06   : > { %2880 = vmatpush3.bf16.msra.mxu0 (!%p2702_p13), %v3160_v26 }
 0xb07   : > { %2881 = vmatprep.subr.bf16.mxu0 (!%p2702_p13), %v3564_v20 }
 0xb0a   : > { %2882 = vmatpush3.bf16.msra.mxu0 (!%p2702_p13), %v3161_v27 }
 0xb0b   : > { %2883 = vmatprep.subr.bf16.mxu0 (!%p2702_p13), %v3564_v20 }
 0xb0e   : > { %2884 = vmatpush3.bf16.msra.mxu0 (!%p2702_p13), %v3162_v28 }
 0xb0f   : > { %2885 = vmatprep.subr.bf16.mxu0 (!%p2702_p13), %v3564_v20 }
 0xb12   : > { %2886 = vmatpush3.bf16.msra.mxu0 (!%p2702_p13), %v3163_v29 }
 0xbc8   : > { %v2768_v62 = vpop.f32.mrb[16].mxu0 }
 0xbc9   : > { %v2769_v0 = vpop.f32.mrb[17].mxu0 }
 0xbca   : > { %v2770_v1 = vadd.f32 %v2769_v0, %v2768_v62  ;;  %v2771_v2 = vpop.f32.mrb[18].mxu0 }
 0xbcb   : > { %v2772_v5 = vpop.f32.mrb[19].mxu0 }
 0xbcc   : > { %v2143_v6 = vadd.f32 %v2770_v1, %v2683_v63 }
 0xbce   : > { %v2148_v7 = vadd.f32 %v2143_v6, %v4356_v16  ;;  %v2701_v16 = vld [vmem:[%s926_s19] ss:$0 sm:$0xff]  ;;  %s4644_s19 = sld [smem:[#allocation59_spill]] (!%p2702_p13) }
 0xbd0   : > { %2151 = vadd.xlane.f32.xlu0 %v2148_v7 }
 0xbd4   : > { %v2198_v34 = vld [vmem:[%s4644_s19] sm:$0x1] (!%p2702_p13) }
 0xc5d   : > { %v2152_v8 = vpop.xlane.xlu0 %2151 }
 0xc5e   : > { %v2153_v52 = vmul.f32 0.0078125, %v2152_v8 }
 0xc60   : > { %v2154_v9 = vsub.f32 %v2148_v7, %v2153_v52 }
 0xc62   : > { %v2155_v10 = vmul.f32 %v2154_v9, %v2154_v9 }
 0xc64   : > { %2156 = vadd.xlane.f32.xlu1 %v2155_v10 }
 0xcf1   : > { %v2157_v11 = vpop.xlane.xlu1 %2156 }
 0xcf2   : > { %v2158_v12 = vmul.f32 0.0078125, %v2157_v11 }
 0xcf4   : > { %v2159_v13 = vadd.f32 1e-12, %v2158_v12 }
 0xcf6   : > { %3154 = vrsqrt.f32 %v2159_v13 }
 0xd00   : > { %v3155_v14 = vpop.eup %3154 }
 0xd01   : > { %v2161_v17 = vmul.f32 %v3155_v14, %v2154_v9  ;;  %2180 = sbr.rel (%p2702_p13) target bundleno = 3567 (0xdef), region = 128 }
 0xd03   : > { %v2168_v18 = vmul.f32 %v2700_v15, %v2161_v17 }
 0xd05   : > { %v2175_v19 = vadd.f32 %v2701_v16, %v2168_v18 }
 0xd07   : > { %2176 = vst [vmem:[#allocation2] sm:$0xff] %v2175_v19  ;;  %v2181_v32 = vpack.c.bf16 (!%p2702_p13), %v2175_v19, %v2175_v19 }
 0xd09   : > { %2888 = vmatmul.mubr.bf16.vlgmr.msra.gmra.mrb[0].mxu0 %v2181_v32 }
 0xddc   : > { %v2281_v35 = vpop.f32.mrb[0].mxu0 }
 0xddd   : > { %v2282_v36 = vadd.f32 %v2281_v35, %v2198_v34  ;;  %v2889_v37 = vpop.f32.mrb[1].mxu0 }
 0xdde   : > { %v2284_v38 = vpop.f32.mrb[2].mxu0 }
 0xddf   : > { %3164 = vtanh.f32 %v2282_v36  ;;  %v2890_v39 = vpop.f32.mrb[3].mxu0 }
 0xde9   : > { %v3165_v41 = vpop.eup %3164 }
 0xdea   : > { %v2292_v42 = vmul.f32 %v3165_v41, %v2711_v4 }
 0xdec   : > { %v2293_v43 = vmul.f32 1.1111112, %v2292_v42 }
 0xdee   : > { %2294 = vst [vmem:[%s900_s16] sm:$0x1] %v2293_v43 }
 0xdef PF: > { %s4646_s11 = sld [smem:[#allocation29_spill]]  ;;  %s4647_s14 = sld [smem:[#allocation33_spill]] }
 0xdf0   : > { %s4648_s23 = sld [smem:[#allocation60_spill]]  ;;  %s2308_s2 = sshll.u32 %s900_s16, 4  ;;  %s2309_s2 = int_to_ptr.vmem [resolvable:$true] %s2308_s2 }
 0xdf1   : > { %s2296_s29 = scalar_lea.sflag [#allocation5], %s4097_s17  ;;  %s3404_s20 = scalar_lea.vmem %s2309_s2, 16 }
 0xdf2   : > { %p3405_p9 = scmp.ne.s32.totalorder %s2309_s2, %s3404_s20  ;;  %s3566_s27 = smov [#allocation17]  }
 0xdf3   : > { %s3408_s13 = sshll.u32 %s3566_s27, 4  ;;  %s3409_s13 = int_to_ptr.vmem [resolvable:$false] %s3408_s13 }
 0xdf4   : > { %s3410_s30 = scalar_lea.vmem %s3409_s13, 32  ;;  %p3411_p4 = scmp.lt.s32.totalorder %s2309_s2, %s3409_s13 }
 0xdf5   : > { %s2712_s10 = sshll.u32 %s4646_s11, 4  ;;  %p4649_p8 = scmp.ne.s32.totalorder %s4647_s14, 0 }
 0xdf6   : > { %s4409_s26 = scalar_lea.hbm %s4648_s23, %s2712_s10  ;;  %p3412_p2 = scmp.lt.s32.totalorder %s3410_s30, %s3404_s20 }
 0xdf7   : > { %p3406_p6 = pnand %p3405_p9, %p4649_p8 }
 0xdf8   : > { %p3413_p12 = por %p3412_p2, %p3411_p4 }
 0xdf9   : > { %p3407_p0 = pneg %p3406_p6 }
 0xdfb   : > { %p3414_p7 = pnand %p3413_p12, %p3407_p0 }
 0xdfd   : > { %3417 = shalt.err (!%p3414_p7)
}
 0xdfe   : > { %s3418_s17 = scalar_lea.hbm %s4409_s26, 16  ;;  %s3422_s18 = scalar_lea.hbm %s4648_s23, 32 }
 0xdff   : > { %p3419_p11 = scmp.ne.s32.totalorder %s4409_s26, %s3418_s17  ;;  %p3423_p3 = scmp.lt.u32.totalorder %s4409_s26, %s4648_s23 }
 0xe00   : > { %p3424_p10 = scmp.lt.u32.totalorder %s3422_s18, %s3418_s17  ;;  %p3426_p9 = scmp.lt.u32.totalorder %s3418_s17, %s4409_s26 }
 0xe01   : > { %p3420_p1 = pnand %p3419_p11, %p4649_p8 }
 0xe02   : > { %p3425_p13 = por %p3424_p10, %p3423_p3 }
 0xe03   : > { %p3421_p5 = pneg %p3420_p1 }
 0xe04   : > { %p3427_p6 = por %p3426_p9, %p3425_p13 }
 0xe06   : > { %p3428_p0 = pnand %p3427_p6, %p3421_p5 }
 0xe08   : > { %3431 = shalt.err (!%p3428_p0)
}
 0xe09   : > { %2913 = dma.vmem_to_hbm [thread:$0]  (%p4649_p8), %s2309_s2, 16, %s4409_s26, %s2296_s29  }
 0xe0a PF: > { %s4650_s4 = sld [smem:[#allocation32_spill]]  ;;  %s4651_s3 = sld [smem:[#allocation26_spill]] }
 0xe0b   : > { %s4652_s22 = sld [smem:[#allocation34_spill]] }
 0xe10   : > { %p2948_p4 = scmp.ge.s32.totalorder %s4650_s4, 2  ;;  %s2320_s6 = sand.u32 1, %s4651_s3  }
 0xe11   : > { %p4653_p2 = scmp.ne.s32.totalorder %s4652_s22, 0  ;;  %s2321_s21 = scalar_lea.sflag [#allocation5], %s2320_s6 }
 0xe13   : > { %p2942_p12 = pnand %p2948_p4, %p4653_p2 }
 0xe15   : > { %3497 = dma.done.wait (!%p2942_p12), %s2321_s21, 16  }
 0xe16   : > { %3499 = vsyncadd (!%p2942_p12), %s2321_s21, 4294967280  ;;  %s43_s1 = sadd.s32 1, %s4650_s4   ;;  %s4654_s24 = sld [smem:[#allocation24_spill]] }
 0xe17   : > { %p40_p7 = scmp.ge.s32.totalorder %s43_s1, 6   ;;  %s4655_s25 = sld [smem:[#allocation25_spill]] }
 0xe18   : > { %s4656_s26 = sld [smem:[#allocation39_spill]]  ;;  %s4657_s8 = sld [smem:[#allocation27_spill]] }
 0xe19   : > { %s4658_s29 = sld [smem:[#allocation40_spill]]  ;;  %s4659_s0 = sld [smem:[#allocation30_spill]] }
 0xe1a   : > { %s4660_s30 = sld [smem:[#allocation31_spill]]  ;;  %s4661_s18 = sld [smem:[#allocation37_spill]] }
 0xe1b   : > { %s4662_s19 = sld [smem:[#allocation38_spill]]  ;;  %s4663_s27 = smov %s3518_s28 }
 0xe1c   :  { %42 = sbr.rel (!%p40_p7) target bundleno = 35 (0x23), region = 241 }
 0xe1e   : > { %s4664_s28 = smov %s4657_s8 }
 0xe23   :  { %2325 = vsyncpa [#allocation4], 1 }
 0xe24   :  { %2327 = vsyncpa [#allocation4 + $0x1], 1 }
 0xe25   :  { %2328 = vsyncpa [#allocation7], 1 }
 0xe26   :  { %2330 = vsyncpa [#allocation7 + $0x1], 1 }
 0xe27   :  { %2331 = vsyncpa [#allocation10], 1 }
 0xe28   :  { %2333 = vsyncpa [#allocation10 + $0x1], 1 }
 0xe29   :  { %2334 = vsyncpa [#allocation13], 1 }
 0xe2a   :  { %2336 = vsyncpa [#allocation13 + $0x1], 1 }
 0xe2b   :  { %2337 = vsyncpa [#allocation16], 1 }
 0xe2c   :  { %2338 = vsyncpa [#allocation5], 1 }
 0xe2d   :  { %2340 = vsyncpa [#allocation5 + $0x1], 1 }

</bundles_post_ra>
